<compile_context>
chip_gen: v6e
topology: v6e:2x2x1
jax: 0.10.0
libtpu: 0.0.40
codegen_flags: <defaults>
</compile_context>

<pallas_src>
import math
import functools

import jax
import jax.numpy as jnp
from jax.experimental import pallas as pl

# ----------------------------- model config ---------------------------------
VOCAB_SIZE = 100
EMB_DIM = 32          # embedding_dim == hidden_dim (required by the module)
HIDDEN_DIM = 32
NUM_CLASS = 2
DIM_FF = 64
NUM_HEAD = 2
NUM_LAYERS = 2
MAX_LEN = 128

BATCH = 2
SEQ = 8

# 128-lane-aligned slots inside the packed per-layer weight slab (L, D, 384)
W_QKV_OFF = 0         # (D, 3D) fused QKV projection
W_O_OFF = 128         # (D, D)  attention output projection
W_1_OFF = 256         # (D, F)  feed-forward up projection
W_IN_LANES = 384
OUT_LANES = 128       # lane-dense padded classifier output width


# ----------------------------- Pallas kernel --------------------------------
def _layernorm(x, g, b, eps=1e-5):
    mu = jnp.mean(x, axis=-1, keepdims=True)
    xc = x - mu
    var = jnp.mean(xc * xc, axis=-1, keepdims=True)
    return xc * jax.lax.rsqrt(var + eps) * g + b


def fused_transformer_kernel(x_ref, mask_ref, w_in_ref, w2_ref, vecs_ref,
                             wcls_ref, o_ref, *, num_layers, num_heads):
    """Whole forward pass: NUM_LAYERS encoder layers + Linear + log_softmax."""
    B, S, D = x_ref.shape
    H = num_heads
    hd = D // H
    F = w2_ref.shape[1]
    BS = B * S

    # additive key-padding mask, broadcast ONCE to (H*B, S, S), head-major
    mask = mask_ref[...]                                          # (B, S) f32
    mask_full = jnp.broadcast_to(mask[None, :, None, :],
                                 (H, B, S, S)).reshape(H * B, S, S)

    xf = x_ref[...].reshape(BS, D)                                # f32 running activation

    for li in range(num_layers):                                  # static unroll
        wl = w_in_ref[li]                                         # (D, 384) bf16
        w_qkv = wl[:, W_QKV_OFF:W_QKV_OFF + 3 * D]                # (D, 3D)
        w_o = wl[:, W_O_OFF:W_O_OFF + D]                          # (D, D)
        w_1 = wl[:, W_1_OFF:W_1_OFF + F]                          # (D, F)
        w_2 = w2_ref[li]                                          # (F, D) bf16

        vl = vecs_ref[li]                                         # (8, 128) f32
        b_qkv = vl[0:1, 0:3 * D]
        b_o = vl[1:2, 0:D]
        b_1 = vl[2:3, 0:F]
        b_2 = vl[3:4, 0:D]
        g1, bt1 = vl[4:5, 0:D], vl[5:6, 0:D]
        g2, bt2 = vl[6:7, 0:D], vl[7:8, 0:D]

        # fused QKV projection (1/sqrt(head_dim) pre-folded into Q columns)
        qkv = jnp.dot(xf.astype(jnp.bfloat16), w_qkv,
                      preferred_element_type=jnp.float32) + b_qkv  # (BS, 3D) f32

        # heads as a leading batch dim: (H*B, S, hd), head-major
        def split_heads(base):
            parts = [qkv[:, base + h * hd: base + (h + 1) * hd].reshape(B, S, hd)
                     for h in range(H)]
            return jnp.concatenate(parts, axis=0)                 # (H*B, S, hd)

        qh = split_heads(0).astype(jnp.bfloat16)
        kh = split_heads(D).astype(jnp.bfloat16)
        vh = split_heads(2 * D).astype(jnp.bfloat16)

        # single batched contraction over all (head, batch) pairs
        s = jnp.einsum('bqd,bkd->bqk', qh, kh,
                       preferred_element_type=jnp.float32)        # (H*B, S, S)
        s = s + mask_full
        s = s - jnp.max(s, axis=-1, keepdims=True)
        e = jnp.exp(s)
        p = e * pl.reciprocal(jnp.sum(e, axis=-1, keepdims=True), approx=True)

        oh = jnp.einsum('bqk,bkd->bqd', p.astype(jnp.bfloat16), vh,
                        preferred_element_type=jnp.float32)       # (H*B, S, hd)
        merged = jnp.concatenate([oh[h * B:(h + 1) * B] for h in range(H)],
                                 axis=-1)                         # (B, S, D)

        # ONE output projection over all heads (no per-head accumulation)
        attn = jnp.dot(merged.reshape(BS, D).astype(jnp.bfloat16), w_o,
                       preferred_element_type=jnp.float32) + b_o

        # residual + LayerNorm 1 (post-norm, PyTorch norm_first=False)
        h1 = _layernorm(xf + attn, g1, bt1)

        # feed-forward (relu)
        ff = jnp.dot(h1.astype(jnp.bfloat16), w_1,
                     preferred_element_type=jnp.float32) + b_1
        ff = jnp.maximum(ff, 0.0)
        ff = jnp.dot(ff.astype(jnp.bfloat16), w_2,
                     preferred_element_type=jnp.float32) + b_2

        # residual + LayerNorm 2
        xf = _layernorm(h1 + ff, g2, bt2)

    # classification head on token 0 of each sequence; lane-dense (B, 128)
    # padded logits (padded class columns carry a -1e9 bias -> exp underflows
    # to 0 in the log_softmax); sliced to (B, NUM_CLASS) outside the kernel.
    cls = xf.reshape(B, S, D)[:, 0, :]                            # (B, D)
    wc = wcls_ref[...]                                            # (D+1, 128) f32
    logits = jnp.dot(cls, wc[0:D, :],
                     preferred_element_type=jnp.float32) + wc[D:D + 1, :]
    m = jnp.max(logits, axis=-1, keepdims=True)
    z = logits - m
    lse = jnp.log(jnp.sum(jnp.exp(z), axis=-1, keepdims=True))
    o_ref[...] = z - lse


# ----------------------------- wrappers --------------------------------------
def fused_transformer(x, mask_add, packed):
    B, S, D = x.shape
    kernel = functools.partial(fused_transformer_kernel,
                               num_layers=NUM_LAYERS, num_heads=NUM_HEAD)
    # Rough flop/byte hints so XLA schedules the surrounding glue (embedding
    # gather, mask construction) to overlap with this latency-bound call.
    flops = (NUM_LAYERS * (2 * B * S * D * (3 * D + D + 2 * DIM_FF)
                           + 4 * B * S * S * D)
             + 2 * B * D * OUT_LANES)
    transcendentals = NUM_LAYERS * NUM_HEAD * B * S * S + B * OUT_LANES
    bytes_accessed = (x.size * 4 + mask_add.size * 4
                      + packed["w_in"].size * 2 + packed["w2"].size * 2
                      + packed["vecs"].size * 4 + packed["wcls"].size * 4
                      + B * OUT_LANES * 4)
    # Single invocation, no grid: every operand is a full array resident in
    # VMEM for the whole kernel (~50 KB of weights — fits everywhere,
    # including v7x's 64 MiB VMEM).
    # TODO(synk): if B*S ever grows, add a batch grid with
    # dimension_semantics=("parallel",) so v7x shards across both TensorCores.
    return pl.pallas_call(
        kernel,
        out_shape=jax.ShapeDtypeStruct((B, OUT_LANES), jnp.float32),
        cost_estimate=pl.CostEstimate(flops=flops,
                                      transcendentals=transcendentals,
                                      bytes_accessed=bytes_accessed),
    )(x, mask_add, packed["w_in"], packed["w2"], packed["vecs"], packed["wcls"])


def pack_params(params):
    """One-time, host-side (outside-jit) packing:
       * stack per-layer weights along a leading (L, ...) axis,
       * fold the 1/sqrt(head_dim) attention scale into the Q columns,
       * cast matmul weights to bf16 (accumulation stays f32 in-kernel),
       * pack all per-layer bias / LayerNorm vectors into one (L, 8, 128) slab,
       * pack the classifier weight + bias into one lane-dense (D+1, 128) slab.
    """
    D, F, L, C = HIDDEN_DIM, DIM_FF, NUM_LAYERS, NUM_CLASS
    scale = 1.0 / math.sqrt(D // NUM_HEAD)

    w_in = jnp.zeros((L, D, W_IN_LANES), jnp.float32)
    w2 = jnp.zeros((L, F, D), jnp.float32)
    vecs = jnp.zeros((L, 8, 128), jnp.float32)
    for li, lyr in enumerate(params["layers"]):
        w_qkv = lyr["w_qkv"].at[:, 0:D].multiply(scale)   # fold softmax scale
        b_qkv = lyr["b_qkv"].at[:, 0:D].multiply(scale)
        w_in = w_in.at[li, :, W_QKV_OFF:W_QKV_OFF + 3 * D].set(w_qkv)
        w_in = w_in.at[li, :, W_O_OFF:W_O_OFF + D].set(lyr["w_o"])
        w_in = w_in.at[li, :, W_1_OFF:W_1_OFF + F].set(lyr["w1"])
        w2 = w2.at[li].set(lyr["w2"])
        vecs = vecs.at[li, 0, 0:3 * D].set(b_qkv[0])
        vecs = vecs.at[li, 1, 0:D].set(lyr["b_o"][0])
        vecs = vecs.at[li, 2, 0:F].set(lyr["b1"][0])
        vecs = vecs.at[li, 3, 0:D].set(lyr["b2"][0])
        vecs = vecs.at[li, 4, 0:D].set(lyr["ln1_g"][0])
        vecs = vecs.at[li, 5, 0:D].set(lyr["ln1_b"][0])
        vecs = vecs.at[li, 6, 0:D].set(lyr["ln2_g"][0])
        vecs = vecs.at[li, 7, 0:D].set(lyr["ln2_b"][0])

    # classifier: rows 0..D-1 = weight (padded class columns zero), row D =
    # bias with -1e9 in padded columns so they vanish in the log_softmax.
    wcls = jnp.zeros((D + 1, OUT_LANES), jnp.float32)
    wcls = wcls.at[0:D, 0:C].set(params["w_cls"])
    bias_row = jnp.full((OUT_LANES,), -1e9, jnp.float32).at[0:C].set(
        params["b_cls"][0])
    wcls = wcls.at[D, :].set(bias_row)

    return {
        "embedding": params["embedding"],
        "pe": params["pe"],
        "w_in": w_in.astype(jnp.bfloat16),
        "w2": w2.astype(jnp.bfloat16),
        "vecs": vecs,
        "wcls": wcls,
    }


def make_positional_encoding(d_model, max_len):
    position = jnp.arange(max_len, dtype=jnp.float32)[:, None]
    div_term = jnp.exp(jnp.arange(0, d_model, 2, dtype=jnp.float32)
                       * (-math.log(10000.0) / d_model))
    pe = jnp.zeros((max_len, d_model), dtype=jnp.float32)
    pe = pe.at[:, 0::2].set(jnp.sin(position * div_term))
    pe = pe.at[:, 1::2].set(jnp.cos(position * div_term))
    return pe


def init_params(key):
    def nrm(k, shape, scale=0.05):
        return (scale * jax.random.normal(k, shape)).astype(jnp.float32)

    keys = jax.random.split(key, 4 + NUM_LAYERS)
    params = {
        "embedding": nrm(keys[0], (VOCAB_SIZE, EMB_DIM), 0.1),
        "pe": make_positional_encoding(EMB_DIM, MAX_LEN),
        "w_cls": nrm(keys[1], (HIDDEN_DIM, NUM_CLASS)),
        "b_cls": jnp.zeros((1, NUM_CLASS), jnp.float32),
        "layers": [],
    }
    for li in range(NUM_LAYERS):
        lk = jax.random.split(keys[4 + li], 6)
        params["layers"].append({
            "w_qkv": nrm(lk[0], (HIDDEN_DIM, 3 * HIDDEN_DIM)),
            "b_qkv": jnp.zeros((1, 3 * HIDDEN_DIM), jnp.float32),
            "w_o": nrm(lk[1], (HIDDEN_DIM, HIDDEN_DIM)),
            "b_o": jnp.zeros((1, HIDDEN_DIM), jnp.float32),
            "w1": nrm(lk[2], (HIDDEN_DIM, DIM_FF)),
            "b1": jnp.zeros((1, DIM_FF), jnp.float32),
            "w2": nrm(lk[3], (DIM_FF, HIDDEN_DIM)),
            "b2": jnp.zeros((1, HIDDEN_DIM), jnp.float32),
            "ln1_g": jnp.ones((1, HIDDEN_DIM), jnp.float32),
            "ln1_b": jnp.zeros((1, HIDDEN_DIM), jnp.float32),
            "ln2_g": jnp.ones((1, HIDDEN_DIM), jnp.float32),
            "ln2_b": jnp.zeros((1, HIDDEN_DIM), jnp.float32),
        })
    return params


@jax.jit
def transformer_forward(inputs, lengths, packed):
    # inputs: (B, S) int32 token ids; lengths: (B,) int32
    B, S = inputs.shape

    # embedding gather + positional encoding (plain-JAX glue)
    x = packed["embedding"][inputs] + packed["pe"][:S][None, :, :]

    # key-padding mask -> additive bias per (batch, key): 0 valid / -1e9 padded
    valid = jnp.arange(S)[None, :] < lengths[:, None]              # (B, S) bool
    mask_add = jnp.where(valid, 0.0, -1e9).astype(jnp.float32)     # (B, S)

    # TODO(synk): dropout layers are identity (inference-mode forward).
    out_padded = fused_transformer(x.astype(jnp.float32), mask_add, packed)
    return out_padded[:, :NUM_CLASS]                               # (B, 2)


if __name__ == "__main__":
    key = jax.random.PRNGKey(0)
    pkey, ikey = jax.random.split(key)
    params = init_params(pkey)
    packed = pack_params(params)       # one-time packing, OUTSIDE the jit

    inputs = jax.random.randint(ikey, (BATCH, SEQ), 0, VOCAB_SIZE, dtype=jnp.int32)
    lengths = jnp.array([SEQ, 5], dtype=jnp.int32)   # max(lengths) == SEQ

    log_probs = transformer_forward(inputs, lengths, packed)
    jax.block_until_ready(log_probs)

    assert log_probs.shape == (BATCH, NUM_CLASS)
    assert bool(jnp.all(jnp.isfinite(log_probs)))
    # rows of log_softmax must sum to ~1 in prob space
    assert bool(jnp.allclose(jnp.sum(jnp.exp(log_probs), axis=1), 1.0, atol=1e-4))
    print("KERNEL_OK")
</pallas_src>

<mosaic_0001>
module attributes {stable_mosaic.version = 11 : i64} {
  func.func @fused_transformer_kernel(%arg0: memref<2x8x32xf32, #tpu.memory_space<vmem>>, %arg1: memref<2x8xf32, #tpu.memory_space<vmem>>, %arg2: memref<2x32x384xbf16, #tpu.memory_space<vmem>>, %arg3: memref<2x64x32xbf16, #tpu.memory_space<vmem>>, %arg4: memref<2x8x128xf32, #tpu.memory_space<vmem>>, %arg5: memref<33x128xf32, #tpu.memory_space<vmem>>, %arg6: memref<2x128xf32, #tpu.memory_space<vmem>>) attributes {dimension_semantics = [], scalar_prefetch = 0 : i64, scratch_operands = 0 : i64, tpu.core_type = #tpu.core_type<tc>} {
    %c0 = arith.constant 0 : index
    %c0_0 = arith.constant 0 : index
    %0 = vector.load %arg1[%c0, %c0_0] : memref<2x8xf32, #tpu.memory_space<vmem>>, vector<2x8xf32>
    %1 = vector.shape_cast %0 : vector<2x8xf32> to vector<1x2x1x8xf32>
    %2 = vector.shape_cast %1 : vector<1x2x1x8xf32> to vector<1x2x1x8xf32>
    %3 = vector.broadcast %2 : vector<1x2x1x8xf32> to vector<2x2x8x8xf32>
    %4 = vector.shape_cast %3 : vector<2x2x8x8xf32> to vector<4x8x8xf32>
    %c0_1 = arith.constant 0 : index
    %c0_2 = arith.constant 0 : index
    %c0_3 = arith.constant 0 : index
    %5 = vector.load %arg0[%c0_1, %c0_2, %c0_3] : memref<2x8x32xf32, #tpu.memory_space<vmem>>, vector<2x8x32xf32>
    %6 = vector.shape_cast %5 : vector<2x8x32xf32> to vector<16x32xf32>
    %c0_4 = arith.constant 0 : index
    %c0_5 = arith.constant 0 : index
    %c0_6 = arith.constant 0 : index
    %7 = vector.load %arg2[%c0_4, %c0_5, %c0_6] : memref<2x32x384xbf16, #tpu.memory_space<vmem>>, vector<1x32x384xbf16>
    %8 = vector.shape_cast %7 : vector<1x32x384xbf16> to vector<32x384xbf16>
    %9 = vector.extract_strided_slice %8 {offsets = [0, 0], sizes = [32, 96], strides = [1, 1]} : vector<32x384xbf16> to vector<32x96xbf16>
    %10 = vector.extract_strided_slice %8 {offsets = [0, 128], sizes = [32, 32], strides = [1, 1]} : vector<32x384xbf16> to vector<32x32xbf16>
    %11 = vector.extract_strided_slice %8 {offsets = [0, 256], sizes = [32, 64], strides = [1, 1]} : vector<32x384xbf16> to vector<32x64xbf16>
    %c0_7 = arith.constant 0 : index
    %c0_8 = arith.constant 0 : index
    %c0_9 = arith.constant 0 : index
    %12 = vector.load %arg3[%c0_7, %c0_8, %c0_9] : memref<2x64x32xbf16, #tpu.memory_space<vmem>>, vector<1x64x32xbf16>
    %13 = vector.shape_cast %12 : vector<1x64x32xbf16> to vector<64x32xbf16>
    %c0_10 = arith.constant 0 : index
    %c0_11 = arith.constant 0 : index
    %c0_12 = arith.constant 0 : index
    %14 = vector.load %arg4[%c0_10, %c0_11, %c0_12] : memref<2x8x128xf32, #tpu.memory_space<vmem>>, vector<1x8x128xf32>
    %15 = vector.shape_cast %14 : vector<1x8x128xf32> to vector<8x128xf32>
    %16 = vector.extract_strided_slice %15 {offsets = [0, 0], sizes = [1, 96], strides = [1, 1]} : vector<8x128xf32> to vector<1x96xf32>
    %17 = vector.extract_strided_slice %15 {offsets = [1, 0], sizes = [1, 32], strides = [1, 1]} : vector<8x128xf32> to vector<1x32xf32>
    %18 = vector.extract_strided_slice %15 {offsets = [2, 0], sizes = [1, 64], strides = [1, 1]} : vector<8x128xf32> to vector<1x64xf32>
    %19 = vector.extract_strided_slice %15 {offsets = [3, 0], sizes = [1, 32], strides = [1, 1]} : vector<8x128xf32> to vector<1x32xf32>
    %20 = vector.extract_strided_slice %15 {offsets = [4, 0], sizes = [1, 32], strides = [1, 1]} : vector<8x128xf32> to vector<1x32xf32>
    %21 = vector.extract_strided_slice %15 {offsets = [5, 0], sizes = [1, 32], strides = [1, 1]} : vector<8x128xf32> to vector<1x32xf32>
    %22 = vector.extract_strided_slice %15 {offsets = [6, 0], sizes = [1, 32], strides = [1, 1]} : vector<8x128xf32> to vector<1x32xf32>
    %23 = vector.extract_strided_slice %15 {offsets = [7, 0], sizes = [1, 32], strides = [1, 1]} : vector<8x128xf32> to vector<1x32xf32>
    %24 = arith.truncf %6 : vector<16x32xf32> to vector<16x32xbf16>
    %cst = arith.constant dense<0.000000e+00> : vector<16x96xf32>
    %25 = tpu.matmul %24, %9, %cst {dimension_numbers = #tpu.dot_dimension_numbers<[1], [0], [0], [1], [0, 0, 1, 1], [], []>} : vector<16x32xbf16>, vector<32x96xbf16>, vector<16x96xf32> -> vector<16x96xf32>
    %26 = vector.broadcast %16 : vector<1x96xf32> to vector<16x96xf32>
    %27 = arith.addf %25, %26 : vector<16x96xf32>
    %28 = vector.extract_strided_slice %27 {offsets = [0, 0], sizes = [16, 16], strides = [1, 1]} : vector<16x96xf32> to vector<16x16xf32>
    %29 = vector.shape_cast %28 : vector<16x16xf32> to vector<2x8x16xf32>
    %30 = vector.extract_strided_slice %27 {offsets = [0, 16], sizes = [16, 16], strides = [1, 1]} : vector<16x96xf32> to vector<16x16xf32>
    %31 = vector.shape_cast %30 : vector<16x16xf32> to vector<2x8x16xf32>
    %32 = tpu.concatenate %29, %31 in 0 : vector<2x8x16xf32>, vector<2x8x16xf32> -> vector<4x8x16xf32>
    %33 = arith.truncf %32 : vector<4x8x16xf32> to vector<4x8x16xbf16>
    %34 = vector.extract_strided_slice %27 {offsets = [0, 32], sizes = [16, 16], strides = [1, 1]} : vector<16x96xf32> to vector<16x16xf32>
    %35 = vector.shape_cast %34 : vector<16x16xf32> to vector<2x8x16xf32>
    %36 = vector.extract_strided_slice %27 {offsets = [0, 48], sizes = [16, 16], strides = [1, 1]} : vector<16x96xf32> to vector<16x16xf32>
    %37 = vector.shape_cast %36 : vector<16x16xf32> to vector<2x8x16xf32>
    %38 = tpu.concatenate %35, %37 in 0 : vector<2x8x16xf32>, vector<2x8x16xf32> -> vector<4x8x16xf32>
    %39 = arith.truncf %38 : vector<4x8x16xf32> to vector<4x8x16xbf16>
    %40 = vector.extract_strided_slice %27 {offsets = [0, 64], sizes = [16, 16], strides = [1, 1]} : vector<16x96xf32> to vector<16x16xf32>
    %41 = vector.shape_cast %40 : vector<16x16xf32> to vector<2x8x16xf32>
    %42 = vector.extract_strided_slice %27 {offsets = [0, 80], sizes = [16, 16], strides = [1, 1]} : vector<16x96xf32> to vector<16x16xf32>
    %43 = vector.shape_cast %42 : vector<16x16xf32> to vector<2x8x16xf32>
    %44 = tpu.concatenate %41, %43 in 0 : vector<2x8x16xf32>, vector<2x8x16xf32> -> vector<4x8x16xf32>
    %45 = arith.truncf %44 : vector<4x8x16xf32> to vector<4x8x16xbf16>
    "tpu.trace_start"() <{level = 10 : i32, message = "bqd,bkd->bqk"}> : () -> ()
    %cst_13 = arith.constant dense<0.000000e+00> : vector<4x8x8xf32>
    %46 = tpu.matmul %33, %39, %cst_13 {dimension_numbers = #tpu.dot_dimension_numbers<[2], [2], [1], [1], [0, 0, 0, 1, 1, 1], [0], [0]>} : vector<4x8x16xbf16>, vector<4x8x16xbf16>, vector<4x8x8xf32> -> vector<4x8x8xf32>
    "tpu.trace_stop"() : () -> ()
    %47 = arith.addf %46, %4 : vector<4x8x8xf32>
    %cst_14 = arith.constant dense<0xFF800000> : vector<4x8xf32>
    %48 = vector.multi_reduction <maximumf>, %47, %cst_14 [2] : vector<4x8x8xf32> to vector<4x8xf32>
    %49 = vector.shape_cast %48 : vector<4x8xf32> to vector<4x8x1xf32>
    %50 = vector.broadcast %49 : vector<4x8x1xf32> to vector<4x8x8xf32>
    %51 = arith.subf %47, %50 : vector<4x8x8xf32>
    %52 = math.exp %51 : vector<4x8x8xf32>
    %cst_15 = arith.constant dense<0.000000e+00> : vector<4x8xf32>
    %53 = vector.multi_reduction <add>, %52, %cst_15 [2] : vector<4x8x8xf32> to vector<4x8xf32>
    %54 = vector.shape_cast %53 : vector<4x8xf32> to vector<4x8x1xf32>
    %55 = tpu.reciprocal %54 {approx = true} : vector<4x8x1xf32> -> vector<4x8x1xf32>
    %56 = vector.broadcast %55 : vector<4x8x1xf32> to vector<4x8x8xf32>
    %57 = arith.mulf %52, %56 : vector<4x8x8xf32>
    %58 = arith.truncf %57 : vector<4x8x8xf32> to vector<4x8x8xbf16>
    "tpu.trace_start"() <{level = 10 : i32, message = "bqk,bkd->bqd"}> : () -> ()
    %cst_16 = arith.constant dense<0.000000e+00> : vector<4x8x16xf32>
    %59 = tpu.matmul %58, %45, %cst_16 {dimension_numbers = #tpu.dot_dimension_numbers<[2], [1], [1], [2], [0, 0, 0, 1, 1, 2], [0], [0]>} : vector<4x8x8xbf16>, vector<4x8x16xbf16>, vector<4x8x16xf32> -> vector<4x8x16xf32>
    "tpu.trace_stop"() : () -> ()
    %60 = vector.extract_strided_slice %59 {offsets = [0, 0, 0], sizes = [2, 8, 16], strides = [1, 1, 1]} : vector<4x8x16xf32> to vector<2x8x16xf32>
    %61 = vector.extract_strided_slice %59 {offsets = [2, 0, 0], sizes = [2, 8, 16], strides = [1, 1, 1]} : vector<4x8x16xf32> to vector<2x8x16xf32>
    %62 = tpu.concatenate %60, %61 in 2 : vector<2x8x16xf32>, vector<2x8x16xf32> -> vector<2x8x32xf32>
    %63 = vector.shape_cast %62 : vector<2x8x32xf32> to vector<16x32xf32>
    %64 = arith.truncf %63 : vector<16x32xf32> to vector<16x32xbf16>
    %cst_17 = arith.constant dense<0.000000e+00> : vector<16x32xf32>
    %65 = tpu.matmul %64, %10, %cst_17 {dimension_numbers = #tpu.dot_dimension_numbers<[1], [0], [0], [1], [0, 0, 1, 1], [], []>} : vector<16x32xbf16>, vector<32x32xbf16>, vector<16x32xf32> -> vector<16x32xf32>
    %66 = vector.broadcast %17 : vector<1x32xf32> to vector<16x32xf32>
    %67 = arith.addf %65, %66 : vector<16x32xf32>
    %68 = arith.addf %6, %67 : vector<16x32xf32>
    %cst_18 = arith.constant dense<0.000000e+00> : vector<16xf32>
    %69 = vector.multi_reduction <add>, %68, %cst_18 [1] : vector<16x32xf32> to vector<16xf32>
    %70 = vector.shape_cast %69 : vector<16xf32> to vector<16x1xf32>
    %cst_19 = arith.constant 3.200000e+01 : f32
    %71 = vector.broadcast %cst_19 : f32 to vector<16x1xf32>
    %72 = arith.divf %70, %71 : vector<16x1xf32>
    %73 = vector.broadcast %72 : vector<16x1xf32> to vector<16x32xf32>
    %74 = arith.subf %68, %73 : vector<16x32xf32>
    %75 = arith.mulf %74, %74 : vector<16x32xf32>
    %cst_20 = arith.constant dense<0.000000e+00> : vector<16xf32>
    %76 = vector.multi_reduction <add>, %75, %cst_20 [1] : vector<16x32xf32> to vector<16xf32>
    %77 = vector.shape_cast %76 : vector<16xf32> to vector<16x1xf32>
    %cst_21 = arith.constant 3.200000e+01 : f32
    %78 = vector.broadcast %cst_21 : f32 to vector<16x1xf32>
    %79 = arith.divf %77, %78 : vector<16x1xf32>
    %cst_22 = arith.constant 9.99999974E-6 : f32
    %80 = vector.broadcast %cst_22 : f32 to vector<16x1xf32>
    %81 = arith.addf %79, %80 : vector<16x1xf32>
    %82 = math.rsqrt %81 : vector<16x1xf32>
    %83 = vector.broadcast %82 : vector<16x1xf32> to vector<16x32xf32>
    %84 = arith.mulf %74, %83 : vector<16x32xf32>
    %85 = vector.broadcast %20 : vector<1x32xf32> to vector<16x32xf32>
    %86 = arith.mulf %84, %85 : vector<16x32xf32>
    %87 = vector.broadcast %21 : vector<1x32xf32> to vector<16x32xf32>
    %88 = arith.addf %86, %87 : vector<16x32xf32>
    %89 = arith.truncf %88 : vector<16x32xf32> to vector<16x32xbf16>
    %cst_23 = arith.constant dense<0.000000e+00> : vector<16x64xf32>
    %90 = tpu.matmul %89, %11, %cst_23 {dimension_numbers = #tpu.dot_dimension_numbers<[1], [0], [0], [1], [0, 0, 1, 1], [], []>} : vector<16x32xbf16>, vector<32x64xbf16>, vector<16x64xf32> -> vector<16x64xf32>
    %91 = vector.broadcast %18 : vector<1x64xf32> to vector<16x64xf32>
    %92 = arith.addf %90, %91 : vector<16x64xf32>
    %cst_24 = arith.constant 0.000000e+00 : f32
    %93 = vector.broadcast %cst_24 : f32 to vector<16x64xf32>
    %94 = arith.maximumf %92, %93 : vector<16x64xf32>
    %95 = arith.truncf %94 : vector<16x64xf32> to vector<16x64xbf16>
    %cst_25 = arith.constant dense<0.000000e+00> : vector<16x32xf32>
    %96 = tpu.matmul %95, %13, %cst_25 {dimension_numbers = #tpu.dot_dimension_numbers<[1], [0], [0], [1], [0, 0, 1, 1], [], []>} : vector<16x64xbf16>, vector<64x32xbf16>, vector<16x32xf32> -> vector<16x32xf32>
    %97 = vector.broadcast %19 : vector<1x32xf32> to vector<16x32xf32>
    %98 = arith.addf %96, %97 : vector<16x32xf32>
    %99 = arith.addf %88, %98 : vector<16x32xf32>
    %cst_26 = arith.constant dense<0.000000e+00> : vector<16xf32>
    %100 = vector.multi_reduction <add>, %99, %cst_26 [1] : vector<16x32xf32> to vector<16xf32>
    %101 = vector.shape_cast %100 : vector<16xf32> to vector<16x1xf32>
    %cst_27 = arith.constant 3.200000e+01 : f32
    %102 = vector.broadcast %cst_27 : f32 to vector<16x1xf32>
    %103 = arith.divf %101, %102 : vector<16x1xf32>
    %104 = vector.broadcast %103 : vector<16x1xf32> to vector<16x32xf32>
    %105 = arith.subf %99, %104 : vector<16x32xf32>
    %106 = arith.mulf %105, %105 : vector<16x32xf32>
    %cst_28 = arith.constant dense<0.000000e+00> : vector<16xf32>
    %107 = vector.multi_reduction <add>, %106, %cst_28 [1] : vector<16x32xf32> to vector<16xf32>
    %108 = vector.shape_cast %107 : vector<16xf32> to vector<16x1xf32>
    %cst_29 = arith.constant 3.200000e+01 : f32
    %109 = vector.broadcast %cst_29 : f32 to vector<16x1xf32>
    %110 = arith.divf %108, %109 : vector<16x1xf32>
    %cst_30 = arith.constant 9.99999974E-6 : f32
    %111 = vector.broadcast %cst_30 : f32 to vector<16x1xf32>
    %112 = arith.addf %110, %111 : vector<16x1xf32>
    %113 = math.rsqrt %112 : vector<16x1xf32>
    %114 = vector.broadcast %113 : vector<16x1xf32> to vector<16x32xf32>
    %115 = arith.mulf %105, %114 : vector<16x32xf32>
    %116 = vector.broadcast %22 : vector<1x32xf32> to vector<16x32xf32>
    %117 = arith.mulf %115, %116 : vector<16x32xf32>
    %118 = vector.broadcast %23 : vector<1x32xf32> to vector<16x32xf32>
    %119 = arith.addf %117, %118 : vector<16x32xf32>
    %c1 = arith.constant 1 : index
    %c0_31 = arith.constant 0 : index
    %c0_32 = arith.constant 0 : index
    %120 = vector.load %arg2[%c1, %c0_31, %c0_32] : memref<2x32x384xbf16, #tpu.memory_space<vmem>>, vector<1x32x384xbf16>
    %121 = vector.shape_cast %120 : vector<1x32x384xbf16> to vector<32x384xbf16>
    %122 = vector.extract_strided_slice %121 {offsets = [0, 0], sizes = [32, 96], strides = [1, 1]} : vector<32x384xbf16> to vector<32x96xbf16>
    %123 = vector.extract_strided_slice %121 {offsets = [0, 128], sizes = [32, 32], strides = [1, 1]} : vector<32x384xbf16> to vector<32x32xbf16>
    %124 = vector.extract_strided_slice %121 {offsets = [0, 256], sizes = [32, 64], strides = [1, 1]} : vector<32x384xbf16> to vector<32x64xbf16>
    %c1_33 = arith.constant 1 : index
    %c0_34 = arith.constant 0 : index
    %c0_35 = arith.constant 0 : index
    %125 = vector.load %arg3[%c1_33, %c0_34, %c0_35] : memref<2x64x32xbf16, #tpu.memory_space<vmem>>, vector<1x64x32xbf16>
    %126 = vector.shape_cast %125 : vector<1x64x32xbf16> to vector<64x32xbf16>
    %c1_36 = arith.constant 1 : index
    %c0_37 = arith.constant 0 : index
    %c0_38 = arith.constant 0 : index
    %127 = vector.load %arg4[%c1_36, %c0_37, %c0_38] : memref<2x8x128xf32, #tpu.memory_space<vmem>>, vector<1x8x128xf32>
    %128 = vector.shape_cast %127 : vector<1x8x128xf32> to vector<8x128xf32>
    %129 = vector.extract_strided_slice %128 {offsets = [0, 0], sizes = [1, 96], strides = [1, 1]} : vector<8x128xf32> to vector<1x96xf32>
    %130 = vector.extract_strided_slice %128 {offsets = [1, 0], sizes = [1, 32], strides = [1, 1]} : vector<8x128xf32> to vector<1x32xf32>
    %131 = vector.extract_strided_slice %128 {offsets = [2, 0], sizes = [1, 64], strides = [1, 1]} : vector<8x128xf32> to vector<1x64xf32>
    %132 = vector.extract_strided_slice %128 {offsets = [3, 0], sizes = [1, 32], strides = [1, 1]} : vector<8x128xf32> to vector<1x32xf32>
    %133 = vector.extract_strided_slice %128 {offsets = [4, 0], sizes = [1, 32], strides = [1, 1]} : vector<8x128xf32> to vector<1x32xf32>
    %134 = vector.extract_strided_slice %128 {offsets = [5, 0], sizes = [1, 32], strides = [1, 1]} : vector<8x128xf32> to vector<1x32xf32>
    %135 = vector.extract_strided_slice %128 {offsets = [6, 0], sizes = [1, 32], strides = [1, 1]} : vector<8x128xf32> to vector<1x32xf32>
    %136 = vector.extract_strided_slice %128 {offsets = [7, 0], sizes = [1, 32], strides = [1, 1]} : vector<8x128xf32> to vector<1x32xf32>
    %137 = arith.truncf %119 : vector<16x32xf32> to vector<16x32xbf16>
    %cst_39 = arith.constant dense<0.000000e+00> : vector<16x96xf32>
    %138 = tpu.matmul %137, %122, %cst_39 {dimension_numbers = #tpu.dot_dimension_numbers<[1], [0], [0], [1], [0, 0, 1, 1], [], []>} : vector<16x32xbf16>, vector<32x96xbf16>, vector<16x96xf32> -> vector<16x96xf32>
    %139 = vector.broadcast %129 : vector<1x96xf32> to vector<16x96xf32>
    %140 = arith.addf %138, %139 : vector<16x96xf32>
    %141 = vector.extract_strided_slice %140 {offsets = [0, 0], sizes = [16, 16], strides = [1, 1]} : vector<16x96xf32> to vector<16x16xf32>
    %142 = vector.shape_cast %141 : vector<16x16xf32> to vector<2x8x16xf32>
    %143 = vector.extract_strided_slice %140 {offsets = [0, 16], sizes = [16, 16], strides = [1, 1]} : vector<16x96xf32> to vector<16x16xf32>
    %144 = vector.shape_cast %143 : vector<16x16xf32> to vector<2x8x16xf32>
    %145 = tpu.concatenate %142, %144 in 0 : vector<2x8x16xf32>, vector<2x8x16xf32> -> vector<4x8x16xf32>
    %146 = arith.truncf %145 : vector<4x8x16xf32> to vector<4x8x16xbf16>
    %147 = vector.extract_strided_slice %140 {offsets = [0, 32], sizes = [16, 16], strides = [1, 1]} : vector<16x96xf32> to vector<16x16xf32>
    %148 = vector.shape_cast %147 : vector<16x16xf32> to vector<2x8x16xf32>
    %149 = vector.extract_strided_slice %140 {offsets = [0, 48], sizes = [16, 16], strides = [1, 1]} : vector<16x96xf32> to vector<16x16xf32>
    %150 = vector.shape_cast %149 : vector<16x16xf32> to vector<2x8x16xf32>
    %151 = tpu.concatenate %148, %150 in 0 : vector<2x8x16xf32>, vector<2x8x16xf32> -> vector<4x8x16xf32>
    %152 = arith.truncf %151 : vector<4x8x16xf32> to vector<4x8x16xbf16>
    %153 = vector.extract_strided_slice %140 {offsets = [0, 64], sizes = [16, 16], strides = [1, 1]} : vector<16x96xf32> to vector<16x16xf32>
    %154 = vector.shape_cast %153 : vector<16x16xf32> to vector<2x8x16xf32>
    %155 = vector.extract_strided_slice %140 {offsets = [0, 80], sizes = [16, 16], strides = [1, 1]} : vector<16x96xf32> to vector<16x16xf32>
    %156 = vector.shape_cast %155 : vector<16x16xf32> to vector<2x8x16xf32>
    %157 = tpu.concatenate %154, %156 in 0 : vector<2x8x16xf32>, vector<2x8x16xf32> -> vector<4x8x16xf32>
    %158 = arith.truncf %157 : vector<4x8x16xf32> to vector<4x8x16xbf16>
    "tpu.trace_start"() <{level = 10 : i32, message = "bqd,bkd->bqk"}> : () -> ()
    %cst_40 = arith.constant dense<0.000000e+00> : vector<4x8x8xf32>
    %159 = tpu.matmul %146, %152, %cst_40 {dimension_numbers = #tpu.dot_dimension_numbers<[2], [2], [1], [1], [0, 0, 0, 1, 1, 1], [0], [0]>} : vector<4x8x16xbf16>, vector<4x8x16xbf16>, vector<4x8x8xf32> -> vector<4x8x8xf32>
    "tpu.trace_stop"() : () -> ()
    %160 = arith.addf %159, %4 : vector<4x8x8xf32>
    %cst_41 = arith.constant dense<0xFF800000> : vector<4x8xf32>
    %161 = vector.multi_reduction <maximumf>, %160, %cst_41 [2] : vector<4x8x8xf32> to vector<4x8xf32>
    %162 = vector.shape_cast %161 : vector<4x8xf32> to vector<4x8x1xf32>
    %163 = vector.broadcast %162 : vector<4x8x1xf32> to vector<4x8x8xf32>
    %164 = arith.subf %160, %163 : vector<4x8x8xf32>
    %165 = math.exp %164 : vector<4x8x8xf32>
    %cst_42 = arith.constant dense<0.000000e+00> : vector<4x8xf32>
    %166 = vector.multi_reduction <add>, %165, %cst_42 [2] : vector<4x8x8xf32> to vector<4x8xf32>
    %167 = vector.shape_cast %166 : vector<4x8xf32> to vector<4x8x1xf32>
    %168 = tpu.reciprocal %167 {approx = true} : vector<4x8x1xf32> -> vector<4x8x1xf32>
    %169 = vector.broadcast %168 : vector<4x8x1xf32> to vector<4x8x8xf32>
    %170 = arith.mulf %165, %169 : vector<4x8x8xf32>
    %171 = arith.truncf %170 : vector<4x8x8xf32> to vector<4x8x8xbf16>
    "tpu.trace_start"() <{level = 10 : i32, message = "bqk,bkd->bqd"}> : () -> ()
    %cst_43 = arith.constant dense<0.000000e+00> : vector<4x8x16xf32>
    %172 = tpu.matmul %171, %158, %cst_43 {dimension_numbers = #tpu.dot_dimension_numbers<[2], [1], [1], [2], [0, 0, 0, 1, 1, 2], [0], [0]>} : vector<4x8x8xbf16>, vector<4x8x16xbf16>, vector<4x8x16xf32> -> vector<4x8x16xf32>
    "tpu.trace_stop"() : () -> ()
    %173 = vector.extract_strided_slice %172 {offsets = [0, 0, 0], sizes = [2, 8, 16], strides = [1, 1, 1]} : vector<4x8x16xf32> to vector<2x8x16xf32>
    %174 = vector.extract_strided_slice %172 {offsets = [2, 0, 0], sizes = [2, 8, 16], strides = [1, 1, 1]} : vector<4x8x16xf32> to vector<2x8x16xf32>
    %175 = tpu.concatenate %173, %174 in 2 : vector<2x8x16xf32>, vector<2x8x16xf32> -> vector<2x8x32xf32>
    %176 = vector.shape_cast %175 : vector<2x8x32xf32> to vector<16x32xf32>
    %177 = arith.truncf %176 : vector<16x32xf32> to vector<16x32xbf16>
    %cst_44 = arith.constant dense<0.000000e+00> : vector<16x32xf32>
    %178 = tpu.matmul %177, %123, %cst_44 {dimension_numbers = #tpu.dot_dimension_numbers<[1], [0], [0], [1], [0, 0, 1, 1], [], []>} : vector<16x32xbf16>, vector<32x32xbf16>, vector<16x32xf32> -> vector<16x32xf32>
    %179 = vector.broadcast %130 : vector<1x32xf32> to vector<16x32xf32>
    %180 = arith.addf %178, %179 : vector<16x32xf32>
    %181 = arith.addf %119, %180 : vector<16x32xf32>
    %cst_45 = arith.constant dense<0.000000e+00> : vector<16xf32>
    %182 = vector.multi_reduction <add>, %181, %cst_45 [1] : vector<16x32xf32> to vector<16xf32>
    %183 = vector.shape_cast %182 : vector<16xf32> to vector<16x1xf32>
    %cst_46 = arith.constant 3.200000e+01 : f32
    %184 = vector.broadcast %cst_46 : f32 to vector<16x1xf32>
    %185 = arith.divf %183, %184 : vector<16x1xf32>
    %186 = vector.broadcast %185 : vector<16x1xf32> to vector<16x32xf32>
    %187 = arith.subf %181, %186 : vector<16x32xf32>
    %188 = arith.mulf %187, %187 : vector<16x32xf32>
    %cst_47 = arith.constant dense<0.000000e+00> : vector<16xf32>
    %189 = vector.multi_reduction <add>, %188, %cst_47 [1] : vector<16x32xf32> to vector<16xf32>
    %190 = vector.shape_cast %189 : vector<16xf32> to vector<16x1xf32>
    %cst_48 = arith.constant 3.200000e+01 : f32
    %191 = vector.broadcast %cst_48 : f32 to vector<16x1xf32>
    %192 = arith.divf %190, %191 : vector<16x1xf32>
    %cst_49 = arith.constant 9.99999974E-6 : f32
    %193 = vector.broadcast %cst_49 : f32 to vector<16x1xf32>
    %194 = arith.addf %192, %193 : vector<16x1xf32>
    %195 = math.rsqrt %194 : vector<16x1xf32>
    %196 = vector.broadcast %195 : vector<16x1xf32> to vector<16x32xf32>
    %197 = arith.mulf %187, %196 : vector<16x32xf32>
    %198 = vector.broadcast %133 : vector<1x32xf32> to vector<16x32xf32>
    %199 = arith.mulf %197, %198 : vector<16x32xf32>
    %200 = vector.broadcast %134 : vector<1x32xf32> to vector<16x32xf32>
    %201 = arith.addf %199, %200 : vector<16x32xf32>
    %202 = arith.truncf %201 : vector<16x32xf32> to vector<16x32xbf16>
    %cst_50 = arith.constant dense<0.000000e+00> : vector<16x64xf32>
    %203 = tpu.matmul %202, %124, %cst_50 {dimension_numbers = #tpu.dot_dimension_numbers<[1], [0], [0], [1], [0, 0, 1, 1], [], []>} : vector<16x32xbf16>, vector<32x64xbf16>, vector<16x64xf32> -> vector<16x64xf32>
    %204 = vector.broadcast %131 : vector<1x64xf32> to vector<16x64xf32>
    %205 = arith.addf %203, %204 : vector<16x64xf32>
    %cst_51 = arith.constant 0.000000e+00 : f32
    %206 = vector.broadcast %cst_51 : f32 to vector<16x64xf32>
    %207 = arith.maximumf %205, %206 : vector<16x64xf32>
    %208 = arith.truncf %207 : vector<16x64xf32> to vector<16x64xbf16>
    %cst_52 = arith.constant dense<0.000000e+00> : vector<16x32xf32>
    %209 = tpu.matmul %208, %126, %cst_52 {dimension_numbers = #tpu.dot_dimension_numbers<[1], [0], [0], [1], [0, 0, 1, 1], [], []>} : vector<16x64xbf16>, vector<64x32xbf16>, vector<16x32xf32> -> vector<16x32xf32>
    %210 = vector.broadcast %132 : vector<1x32xf32> to vector<16x32xf32>
    %211 = arith.addf %209, %210 : vector<16x32xf32>
    %212 = arith.addf %201, %211 : vector<16x32xf32>
    %cst_53 = arith.constant dense<0.000000e+00> : vector<16xf32>
    %213 = vector.multi_reduction <add>, %212, %cst_53 [1] : vector<16x32xf32> to vector<16xf32>
    %214 = vector.shape_cast %213 : vector<16xf32> to vector<16x1xf32>
    %cst_54 = arith.constant 3.200000e+01 : f32
    %215 = vector.broadcast %cst_54 : f32 to vector<16x1xf32>
    %216 = arith.divf %214, %215 : vector<16x1xf32>
    %217 = vector.broadcast %216 : vector<16x1xf32> to vector<16x32xf32>
    %218 = arith.subf %212, %217 : vector<16x32xf32>
    %219 = arith.mulf %218, %218 : vector<16x32xf32>
    %cst_55 = arith.constant dense<0.000000e+00> : vector<16xf32>
    %220 = vector.multi_reduction <add>, %219, %cst_55 [1] : vector<16x32xf32> to vector<16xf32>
    %221 = vector.shape_cast %220 : vector<16xf32> to vector<16x1xf32>
    %cst_56 = arith.constant 3.200000e+01 : f32
    %222 = vector.broadcast %cst_56 : f32 to vector<16x1xf32>
    %223 = arith.divf %221, %222 : vector<16x1xf32>
    %cst_57 = arith.constant 9.99999974E-6 : f32
    %224 = vector.broadcast %cst_57 : f32 to vector<16x1xf32>
    %225 = arith.addf %223, %224 : vector<16x1xf32>
    %226 = math.rsqrt %225 : vector<16x1xf32>
    %227 = vector.broadcast %226 : vector<16x1xf32> to vector<16x32xf32>
    %228 = arith.mulf %218, %227 : vector<16x32xf32>
    %229 = vector.broadcast %135 : vector<1x32xf32> to vector<16x32xf32>
    %230 = arith.mulf %228, %229 : vector<16x32xf32>
    %231 = vector.broadcast %136 : vector<1x32xf32> to vector<16x32xf32>
    %232 = arith.addf %230, %231 : vector<16x32xf32>
    %233 = vector.shape_cast %232 : vector<16x32xf32> to vector<2x8x32xf32>
    %234 = vector.extract_strided_slice %233 {offsets = [0, 0, 0], sizes = [2, 1, 32], strides = [1, 1, 1]} : vector<2x8x32xf32> to vector<2x1x32xf32>
    %235 = vector.shape_cast %234 : vector<2x1x32xf32> to vector<2x32xf32>
    %c0_58 = arith.constant 0 : index
    %c0_59 = arith.constant 0 : index
    %236 = vector.load %arg5[%c0_58, %c0_59] : memref<33x128xf32, #tpu.memory_space<vmem>>, vector<33x128xf32>
    %237 = vector.extract_strided_slice %236 {offsets = [0, 0], sizes = [32, 128], strides = [1, 1]} : vector<33x128xf32> to vector<32x128xf32>
    %cst_60 = arith.constant dense<0.000000e+00> : vector<2x128xf32>
    %238 = tpu.matmul %235, %237, %cst_60 {dimension_numbers = #tpu.dot_dimension_numbers<[1], [0], [0], [1], [0, 0, 1, 1], [], []>} : vector<2x32xf32>, vector<32x128xf32>, vector<2x128xf32> -> vector<2x128xf32>
    %239 = vector.extract_strided_slice %236 {offsets = [32, 0], sizes = [1, 128], strides = [1, 1]} : vector<33x128xf32> to vector<1x128xf32>
    %240 = vector.broadcast %239 : vector<1x128xf32> to vector<2x128xf32>
    %241 = arith.addf %238, %240 : vector<2x128xf32>
    %cst_61 = arith.constant dense<0xFF800000> : vector<2xf32>
    %242 = vector.multi_reduction <maximumf>, %241, %cst_61 [1] : vector<2x128xf32> to vector<2xf32>
    %243 = vector.shape_cast %242 : vector<2xf32> to vector<2x1xf32>
    %244 = vector.broadcast %243 : vector<2x1xf32> to vector<2x128xf32>
    %245 = arith.subf %241, %244 : vector<2x128xf32>
    %246 = math.exp %245 : vector<2x128xf32>
    %cst_62 = arith.constant dense<0.000000e+00> : vector<2xf32>
    %247 = vector.multi_reduction <add>, %246, %cst_62 [1] : vector<2x128xf32> to vector<2xf32>
    %248 = vector.shape_cast %247 : vector<2xf32> to vector<2x1xf32>
    %249 = math.log %248 : vector<2x1xf32>
    %250 = vector.broadcast %249 : vector<2x1xf32> to vector<2x128xf32>
    %251 = arith.subf %245, %250 : vector<2x128xf32>
    %c0_63 = arith.constant 0 : index
    %c0_64 = arith.constant 0 : index
    %252 = vector.load %arg6[%c0_63, %c0_64] : memref<2x128xf32, #tpu.memory_space<vmem>>, vector<2x128xf32>
    tpu.vector_store %arg6[%c0_63, %c0_64], %251 {strides = array<i32>} : memref<2x128xf32, #tpu.memory_space<vmem>>, vector<2x128xf32>,
    return
  }
}

</mosaic_0001>

<bundles_post_ra>
// kernel: transformer_forward.1
= control target key start
LH: loop header
LB: loop body
LE: loop exit
PB: predicated region body
PF: predicated region fallthrough
CT: control target
= control target key end

     0   :  { %v2236_v1 = vmov 0.0   ;;  %vm2237_vm0 = vmmov 0   ;;  %vm95_vm1 = vcmask 261120   ;;  %s2687_s0 = inlined_call_operand.vmem [shape: f32[2,8,32], index: 0, kind: input, shape index: {}]   ;;  %s2688_s1 = inlined_call_operand.vmem [shape: f32[2,8], index: 1, kind: input, shape index: {}]   ;;  %s2689_s2 = inlined_call_operand.vmem [shape: bf16[2,32,384], index: 2, kind: input, shape index: {}]   ;;  %s2690_s3 = inlined_call_operand.vmem [shape: bf16[2,64,32], index: 3, kind: input, shape index: {}]   ;;  %s2691_s4 = inlined_call_operand.vmem [shape: f32[2,8,128], index: 4, kind: input, shape index: {}]   ;;  %s2692_s5 = inlined_call_operand.vmem [shape: f32[33,128], index: 5, kind: input, shape index: {}]   ;;  %s2693_s6 = inlined_call_operand.hbm [shape: f32[2,128], index: 6, kind: output, shape index: {}]  }
   0x1   :  { %v2138_v0 = vld [vmem:[%s2689_s2 + $0x18] ss:$12 sps:$4 sm:$0xff]   ;;  %1931 = vmatprep.subr.bf16.mxu1 %v2236_v1  ;;  %1935 = vmatprep.mubr.msk.bf16.mxu1 %vm2237_vm0, %v2236_v1  ;;  %v2141_v2 = vld [vmem:[%s2689_s2] ss:$12 sps:$4 sm:$0xff]  }
   0x2   :  { %1932 = vmatpush3.bf16.msra.mxu1 %v2138_v0  ;;  %v2291_v3 = vld [vmem:[%s2687_s0] sm:$0xff]  ;;  %1945 = vmatprep.subr.bf16.mxu0 %v2236_v1  ;;  %v2298_v4 = vld [vmem:[%s2687_s0 + $0x8] sm:$0xff] }
   0x3   :  { %1933 = vmatprep.subr.bf16.mxu1 %v2236_v1  ;;  %1947 = vmatprep.mubr.msk.bf16.mxu0 %vm2237_vm0, %v2236_v1  ;;  %v78_v5 = vpack.c.bf16 %v2298_v4, %v2291_v3 }
   0x6   :  { %1934 = vmatpush3.bf16.msra.mxu1 %v2141_v2 }
   0x7   :  { %1939 = vmatprep.subr.bf16.mxu1 %v2236_v1 }
   0x9   :  { %1936 = vmatmul.mubr.msk.bf16.vlgmr.msra.gmra.mxu1 %vm95_vm1, %v78_v5 }
   0xa   :  { %1941 = vmatprep.mubr.msk.bf16.mxu1 %vm2237_vm0, %v2236_v1 }
   0xb   :  { %11 = vsyncpa [#allocation3], 0  ;;  %v38_v6 = vlaneseq  ;;  %v2316_v9 = vld [vmem:[%s2691_s4] sm:$0xff]  ;;  %s2238_s30 = smov 96   ;;  %s2239_s7 = smov 112   ;;  %vm155_vm2 = vcmask 130048  }
   0xc   :  { %v2240_v33 = vmov 1966171168   ;;  %v1802_v36 = vld.sshfl [vmem:[%s2688_s1] sm:$0x11 pattern:$0x75316420] }
   0xd   :  { %v2308_v7 = vshrl.u32 %v38_v6, 7  ;;  %v36_v34 = vunpack.c.l.s4 %v2240_v33  ;;  %v34_v37 = vcombine.high %v1802_v36, %v1802_v36  ;;  %vm349_vm3 = vcmask 64512   ;;  %s2241_s1 = smov 64   ;;  %s2242_s14 = smov 16  }
   0xe   :  { %vm403_vm4 = vcmask 1043456   ;;  %vm791_vm5 = vcmask 523264   ;;  %vm1700_vm6 = vcmask 1041409   ;;  %vm1774_vm7 = vcmask 1041408   ;;  %s2243_s29 = smov [#allocation2]  }
   0xf   :  { %v2311_v8 = vsub.s32 0, %v2308_v7  ;;  %v37_v35 = vunpack.c.0.s8 %v36_v34  ;;  %s1794_s8 = sshll.u32 %s2243_s29, 4  ;;  %s1795_s8 = int_to_ptr.vmem [resolvable:$true] %s1794_s8 }
  0x10   :  { %p2219_p1 = scmp.lt.s32.totalorder %s1795_s8, %s1795_s8 }
  0x11   :  { %v82_v11 = vrot.slane %v2316_v9, %v2311_v8  ;;  %v40_v38 = vsub.s32 %v37_v35, %v2308_v7 }
  0x13   :  { %v48_v39 = vrot.slane %v34_v37, %v40_v38  ;;  %v41_v41 = vrot.slane %v1802_v36, %v40_v38 }
  0x15   :  { %v2366_v40 = vrot.slane %v48_v39, %v2311_v8  ;;  %v2370_v44 = vrot.slane %v41_v41, %v2311_v8 }
  0xc9   :  { %v133_v10 = vpop.f32.mrf.mxu1 }
  0xca   :  { %v134_v14 = vadd.f32 %v133_v10, %v82_v11 }
  0xcb   :  { %v1937_v12 = vpop.f32.mrf.mxu1 }
  0xcc   :  { %v2325_v19 = vpack.c.bf16 %v134_v14, %v134_v14 }
  0xcd   :  { %v136_v13 = vpop.f32.mrf.mxu1 }
  0xce   :  { %v137_v15 = vadd.f32 %v136_v13, %v82_v11 }
  0xcf   :  { %v1938_v16 = vpop.f32.mrf.mxu1 }
  0xd0   :  { %v2320_v17 = vpack.c.bf16 %v137_v15, %v137_v15  ;;  %v2118_v18 = vpack.i.bf16 %v137_v15, %v134_v14 }
  0xd2   :  { %203 = vrot.lane.b32.xlu1 %v2320_v17, %s2238_s30  ;;  %2119 = vrot.lane.b32.xlu0 %v2118_v18, %s2239_s7 }
  0xd6   :  { %153 = vrot.lane.b32.xlu0 %v2325_v19, %s2238_s30 }
 0x144   :  { %v204_v20 = vpop.permute.xlu1 %203  ;;  %v2120_v21 = vpop.permute.xlu0 %2119 }
 0x145   :  { %v2122_v22 = vunpack.i.h.bf16 %v2120_v21  ;;  %v2121_v23 = vunpack.i.l.bf16 %v2120_v21  ;;  %v209_v24 = vsel %vm155_vm2, %v204_v20, 0 }
 0x146   :  { %1946 = vmatpush3.bf16.xpose.msra.mxu0 %v209_v24 }
 0x147   :  { %v2330_v25 = vpack.c.bf16 %v2122_v22, %v2122_v22  ;;  %v2332_v26 = vpack.c.bf16 %v2121_v23, %v2121_v23  ;;  %1957 = vmatprep.subr.bf16.mxu0 %v2236_v1 }
 0x148   :  { %v154_v27 = vpop.permute.xlu0 %153 }
 0x149   :  { %v160_v28 = vsel %vm155_vm2, %v154_v27, 0  ;;  %252 = vrot.lane.b32.xlu1 %v2332_v26, %s2238_s30  ;;  %301 = vrot.lane.b32.xlu0 %v2330_v25, %s2238_s30 }
 0x14a   :  { %1940 = vmatpush3.bf16.xpose.msra.mxu1 %v160_v28 }
 0x14b   :  { %1951 = vmatprep.subr.bf16.mxu1 %v2236_v1 }
 0x14d   :  { %1948 = vmatmul.mubr.msk.bf16.vlgmr.msra.gmra.mxu0 %vm155_vm2, %v2320_v17 }
 0x14e   :  { %1959 = vmatprep.mubr.msk.bf16.mxu0 %vm2237_vm0, %v2236_v1 }
 0x151   :  { %1942 = vmatmul.mubr.msk.bf16.vlgmr.msra.gmra.mxu1 %vm155_vm2, %v2325_v19 }
 0x152   :  { %1953 = vmatprep.mubr.msk.bf16.mxu1 %vm2237_vm0, %v2236_v1 }
 0x1bb   :  { %v253_v29 = vpop.permute.xlu1 %252  ;;  %v302_v30 = vpop.permute.xlu0 %301 }
 0x1bc   :  { %v258_v31 = vsel %vm155_vm2, %v253_v29, 0  ;;  %v307_v32 = vsel %vm155_vm2, %v302_v30, 0 }
 0x1bd   :  { %1952 = vmatpush3.bf16.xpose.msra.mxu1 %v258_v31  ;;  %1958 = vmatpush3.bf16.xpose.msra.mxu0 %v307_v32 }
 0x1be   :  { %1963 = vmatprep.subr.bf16.mxu1 %v2236_v1  ;;  %1969 = vmatprep.subr.bf16.mxu0 %v2236_v1 }
 0x1c4   :  { %1954 = vmatmul.mubr.msk.bf16.vlgmr.msra.gmra.mxu1 %vm155_vm2, %v2332_v26  ;;  %1960 = vmatmul.mubr.msk.bf16.vlgmr.msra.gmra.mxu0 %vm155_vm2, %v2330_v25 }
 0x1c5   :  { %1965 = vmatprep.mubr.msk.bf16.mxu1 %vm2237_vm0, %v2236_v1  ;;  %1971 = vmatprep.mubr.msk.bf16.mxu0 %vm2237_vm0, %v2236_v1 }
 0x20d   :  { %v245_v42 = vpop.f32.mrf.mxu0 }
 0x20e   :  { %v246_v43 = vadd.f32 %v245_v42, %v2366_v40 }
 0x20f   :  { %v1949_v45 = vpop.f32.mrf.mxu0 }
 0x210   :  { %v353_v46 = vsel %vm349_vm3, %v246_v43, -inf }
 0x211   :  { %v196_v47 = vpop.f32.mrf.mxu1  ;;  %v248_v48 = vpop.f32.mrf.mxu0  ;;  %354 = vmax.xlane.f32.xlu0 %v353_v46 }
 0x212   :  { %v197_v49 = vadd.f32 %v196_v47, %v2370_v44 }
 0x213   :  { %v1943_v50 = vpop.f32.mrf.mxu1  ;;  %v1950_v51 = vpop.f32.mrf.mxu0 }
 0x214   :  { %v350_v52 = vsel %vm349_vm3, %v197_v49, -inf }
 0x215   :  { %v199_v53 = vpop.f32.mrf.mxu1  ;;  %351 = vmax.xlane.f32.xlu1 %v350_v52 }
 0x216   :  { %v2140_v53 = vld [vmem:[%s2689_s2 + $0x1c] ss:$12 sps:$4 sm:$0xff]  }
 0x217   :  { %v1944_v54 = vpop.f32.mrf.mxu1 }
 0x284   :  { %v294_v55 = vpop.f32.mrf.mxu1  ;;  %v343_v56 = vpop.f32.mrf.mxu0 }
 0x285   :  { %v295_v57 = vadd.f32 %v294_v55, %v2370_v44  ;;  %v344_v58 = vadd.f32 %v343_v56, %v2366_v40  ;;  %v2143_v56 = vld [vmem:[%s2689_s2 + $0x4] ss:$12 sps:$4 sm:$0xff]  }
 0x286   :  { %v1955_v59 = vpop.f32.mrf.mxu1  ;;  %v1961_v60 = vpop.f32.mrf.mxu0 }
 0x287   :  { %v359_v61 = vsel %vm349_vm3, %v344_v58, -inf  ;;  %v356_v62 = vsel %vm349_vm3, %v295_v57, -inf }
 0x288   :  { %v297_v63 = vpop.f32.mrf.mxu1  ;;  %v346_v0 = vpop.f32.mrf.mxu0  ;;  %360 = vmax.xlane.f32.xlu1 %v359_v61  ;;  %357 = vmax.xlane.f32.xlu0 %v356_v62 }
 0x28a   :  { %v1956_v2 = vpop.f32.mrf.mxu1  ;;  %v1962_v5 = vpop.f32.mrf.mxu0 }
 0x299   :  { %447 = vrot.lane.b32.xlu1 %v2320_v17, %s2241_s1 }
 0x29a   :  { %v355_v6 = vpop.xlane.xlu0 %354 }
 0x29b   :  { %v363_v11 = vsub.f32 %v246_v43, %v355_v6 }
 0x29d   :  { %v368_v13 = vmul.f32 1.442695, %v363_v11 }
 0x29e   :  { %398 = vrot.lane.b32.xlu0 %v2325_v19, %s2241_s1  ;;  %v352_v10 = vpop.xlane.xlu1 %351 }
 0x29f   :  { %v362_v12 = vsub.f32 %v197_v49, %v352_v10  ;;  %2162 = vpow2.f32 %v368_v13 }
 0x2a1   :  { %v366_v14 = vmul.f32 1.442695, %v362_v12 }
 0x2a3   :  { %2164 = vpow2.f32 %v366_v14 }
 0x2ac   :  { %v2163_v15 = vpop.eup %2162 }
 0x2ad   :  { %v377_v20 = vsel %vm349_vm3, %v2163_v15, 0.0 }
 0x2b0   :  { %v2165_v16 = vpop.eup %2164 }
 0x2b1   :  { %v374_v18 = vsel %vm349_vm3, %v2165_v16, 0.0 }
 0x2bd   :  { %375 = vadd.xlane.f32.xlu0 %v374_v18  ;;  %378 = vadd.xlane.f32.xlu1 %v377_v20 }
 0x311   :  { %v361_v17 = vpop.xlane.xlu1 %360  ;;  %v358_v21 = vpop.xlane.xlu0 %357 }
 0x312   :  { %v365_v22 = vsub.f32 %v344_v58, %v361_v17  ;;  %v364_v19 = vsub.f32 %v295_v57, %v358_v21 }
 0x314   :  { %v372_v23 = vmul.f32 1.442695, %v365_v22  ;;  %v370_v24 = vmul.f32 1.442695, %v364_v19  ;;  %v604_v19 = vsub.s32 1, %v2308_v7 }
 0x315   :  { %v448_v27 = vpop.permute.xlu1 %447  ;;  %v399_v28 = vpop.permute.xlu0 %398 }
 0x316   :  { %2166 = vpow2.f32 %v372_v23  ;;  %v453_v29 = vsel %vm403_vm4, %v448_v27, 0  ;;  %v405_v30 = vsel %vm403_vm4, %v399_v28, 0  ;;  %v605_v23 = vrot.slane %v2316_v9, %v604_v19 }
 0x317   :  { %2168 = vpow2.f32 %v370_v24  ;;  %1964 = vmatpush3.bf16.msra.mxu1 %v405_v30  ;;  %1970 = vmatpush3.bf16.msra.mxu0 %v453_v29 }
 0x318   :  { %1975 = vmatprep.subr.bf16.mxu1 %v2236_v1  ;;  %1981 = vmatprep.subr.bf16.mxu0 %v2236_v1 }
 0x323   :  { %v2167_v31 = vpop.eup %2166 }
 0x324   :  { %v2169_v32 = vpop.eup %2168  ;;  %v383_v33 = vsel %vm349_vm3, %v2167_v31, 0.0 }
 0x325   :  { %384 = vadd.xlane.f32.xlu1 %v383_v33  ;;  %v380_v34 = vsel %vm349_vm3, %v2169_v32, 0.0 }
 0x326   :  { %381 = vadd.xlane.f32.xlu0 %v380_v34 }
 0x336   :  { %495 = vrot.lane.b32.xlu1 %v2332_v26, %s2241_s1 }
 0x33c   :  { %543 = vrot.lane.b32.xlu0 %v2330_v25, %s2241_s1 }
 0x346   :  { %v379_v35 = vpop.xlane.xlu1 %378  ;;  %v376_v36 = vpop.xlane.xlu0 %375 }
 0x347   :  { %2170 = vrcp.f32 %v379_v35 }
 0x348   :  { %2172 = vrcp.f32 %v376_v36 }
 0x354   :  { %v2171_v37 = vpop.eup %2170 }
 0x355   :  { %v2173_v38 = vpop.eup %2172  ;;  %v391_v39 = vmul.f32 %v2171_v37, %v2163_v15 }
 0x356   :  { %v390_v41 = vmul.f32 %v2173_v38, %v2165_v16 }
 0x357   :  { %v395_v42 = vpack.c.bf16 %v391_v39, %v391_v39 }
 0x358   :  { %v394_v43 = vpack.c.bf16 %v390_v41, %v390_v41 }
 0x359   :  { %1972 = vmatmul.mubr.msk.bf16.vlgmr.msra.gmra.mxu0 %vm349_vm3, %v395_v42 }
 0x35a   :  { %1966 = vmatmul.mubr.msk.bf16.vlgmr.msra.gmra.mxu1 %vm349_vm3, %v394_v43  ;;  %1983 = vmatprep.mubr.msk.bf16.mxu0 %vm2237_vm0, %v2236_v1 }
 0x35b   :  { %1977 = vmatprep.mubr.msk.bf16.mxu1 %vm2237_vm0, %v2236_v1 }
 0x3ae   :  { %v385_v25 = vpop.xlane.xlu1 %384 }
 0x3af   :  { %2174 = vrcp.f32 %v385_v25  ;;  %v382_v26 = vpop.xlane.xlu0 %381 }
 0x3b0   :  { %2176 = vrcp.f32 %v382_v26 }
 0x3b2   :  { %v496_v45 = vpop.permute.xlu1 %495 }
 0x3b3   :  { %v501_v46 = vsel %vm403_vm4, %v496_v45, 0  ;;  %v544_v47 = vpop.permute.xlu0 %543  ;;  %v2145_v45 = vld [vmem:[%s2689_s2 + $0x8] ss:$12 sps:$4 sm:$0xff]  }
 0x3b4   :  { %v549_v48 = vsel %vm403_vm4, %v544_v47, 0  ;;  %1976 = vmatpush3.bf16.msra.mxu1 %v501_v46  ;;  %v2146_v46 = vld [vmem:[%s2690_s3 + $0x18] sm:$0xff]  }
 0x3b5   :  { %1982 = vmatpush3.bf16.msra.mxu0 %v549_v48  ;;  %1987 = vmatprep.subr.bf16.mxu1 %v2236_v1 }
 0x3b6   :  { %1995 = vmatprep.subr.bf16.mxu0 %v2236_v1 }
 0x3bc   :  { %v2175_v49 = vpop.eup %2174 }
 0x3bd   :  { %v2177_v50 = vpop.eup %2176  ;;  %v393_v51 = vmul.f32 %v2175_v49, %v2167_v31 }
 0x3be   :  { %v392_v52 = vmul.f32 %v2177_v50, %v2169_v32 }
 0x3bf   :  { %v397_v54 = vpack.c.bf16 %v393_v51, %v393_v51 }
 0x3c0   :  { %v396_v55 = vpack.c.bf16 %v392_v52, %v392_v52 }
 0x3c1   :  { %1984 = vmatmul.mubr.msk.bf16.vlgmr.msra.gmra.mxu0 %vm349_vm3, %v397_v54 }
 0x3c2   :  { %1978 = vmatmul.mubr.msk.bf16.vlgmr.msra.gmra.mxu1 %vm349_vm3, %v396_v55  ;;  %1999 = vmatprep.mubr.msk.bf16.mxu0 %vm2237_vm0, %v2236_v1 }
 0x3c3   :  { %1988 = vmatpush3.bf16.msra.mxu1 %v2140_v53  ;;  %1991 = vmatprep.mubr.msk.bf16.mxu1 %vm2237_vm0, %v2236_v1  ;;  %v689_v53 = vsub.s32 4, %v2308_v7 }
 0x3c4   :  { %1989 = vmatprep.subr.bf16.mxu1 %v2236_v1 }
 0x3c7   :  { %1990 = vmatpush3.bf16.msra.mxu1 %v2143_v56  ;;  %v690_v56 = vrot.slane %v2316_v9, %v689_v53 }
 0x3c8   :  { %2003 = vmatprep.subr.bf16.mxu1 %v2236_v1 }
 0x419   :  { %v489_v57 = vpop.f32.mrf.mxu0 }
 0x41a   :  { %v441_v58 = vpop.f32.mrf.mxu1 }
 0x41b   :  { %v1973_v59 = vpop.f32.mrf.mxu0 }
 0x41c   :  { %v1967_v60 = vpop.f32.mrf.mxu1 }
 0x41d   :  { %v492_v61 = vpop.f32.mrf.mxu0 }
 0x41e   :  { %v444_v62 = vpop.f32.mrf.mxu1 }
 0x41f   :  { %v1974_v63 = vpop.f32.mrf.mxu0 }
 0x420   :  { %v1968_v0 = vpop.f32.mrf.mxu1 }
 0x481   :  { %v585_v2 = vpop.f32.mrf.mxu0 }
 0x482   :  { %v537_v5 = vpop.f32.mrf.mxu1 }
 0x483   :  { %v2123_v6 = vpack.i.bf16 %v585_v2, %v537_v5  ;;  %v1985_v10 = vpop.f32.mrf.mxu0  ;;  %v2147_v5 = vld [vmem:[%s2690_s3 + $0x10] sm:$0xff]  }
 0x484   :  { %v1979_v11 = vpop.f32.mrf.mxu1  ;;  %v2149_v10 = vld [vmem:[%s2690_s3] sm:$0xff]  }
 0x485   :  { %2124 = vrot.lane.b32.xlu1 %v2123_v6, %s2242_s14  ;;  %v588_v12 = vpop.f32.mrf.mxu0  ;;  %v2148_v6 = vld [vmem:[%s2690_s3 + $0x8] sm:$0xff]   ;;  %v702_v11 = vsub.s32 2, %v2308_v7 }
 0x486   :  { %v540_v13 = vpop.f32.mrf.mxu1 }
 0x487   :  { %v1986_v14 = vpop.f32.mrf.mxu0  ;;  %v703_v12 = vrot.slane %v2316_v9, %v702_v11 }
 0x488   :  { %v1980_v15 = vpop.f32.mrf.mxu1 }
 0x4f7   :  { %v2125_v16 = vpop.permute.xlu1 %2124 }
 0x4f8   :  { %v2127_v18 = vunpack.i.h.bf16 %v2125_v16  ;;  %v2126_v20 = vunpack.i.l.bf16 %v2125_v16 }
 0x4fa   :  { %v600_v17 = vsel %vm155_vm2, %v489_v57, %v2127_v18  ;;  %v599_v21 = vsel %vm155_vm2, %v441_v58, %v2126_v20  ;;  %v695_v57 = vsub.s32 5, %v2308_v7 }
 0x4fb   :  { %v601_v22 = vpack.c.bf16 %v600_v17, %v599_v21 }
 0x4fc   :  { %v696_v61 = vrot.slane %v2316_v9, %v695_v57 }
 0x4fd   :  { %1992 = vmatmul.mubr.msk.bf16.vlgmr.msra.gmra.mxu1 %vm95_vm1, %v601_v22 }
 0x4fe   :  { %2011 = vmatprep.mubr.msk.bf16.mxu1 %vm2237_vm0, %v2236_v1  ;;  %2004 = vmatpush3.bf16.msra.mxu1 %v2146_v46  ;;  %v2152_v46 = vld [vmem:[%s2689_s2 + $0x30] ss:$12 sps:$4 sm:$0xff]  }
 0x4ff   :  { %2005 = vmatprep.subr.bf16.mxu1 %v2236_v1 }
 0x502   :  { %2006 = vmatpush3.bf16.msra.mxu1 %v2147_v5 }
 0x503   :  { %2007 = vmatprep.subr.bf16.mxu1 %v2236_v1 }
 0x506   :  { %2008 = vmatpush3.bf16.msra.mxu1 %v2148_v6 }
 0x507   :  { %2009 = vmatprep.subr.bf16.mxu1 %v2236_v1 }
 0x50a   :  { %2010 = vmatpush3.bf16.msra.mxu1 %v2149_v10  ;;  %v2513_v10 = vld [vmem:[%s2691_s4 + $0x8] sm:$0xff] }
 0x50b   :  { %2029 = vmatprep.subr.bf16.mxu1 %v2236_v1 }
 0x5bd   :  { %v651_v24 = vpop.f32.mrf.mxu1 }
 0x5be   :  { %v652_v27 = vadd.f32 %v651_v24, %v605_v23 }
 0x5bf   :  { %v1993_v28 = vpop.f32.mrf.mxu1 }
 0x5c0   :  { %v658_v29 = vadd.f32 %v652_v27, %v2291_v3 }
 0x5c1   :  { %v654_v30 = vpop.f32.mrf.mxu1 }
 0x5c2   :  { %v655_v31 = vadd.f32 %v654_v30, %v605_v23  ;;  %v660_v32 = vsel %vm95_vm1, %v658_v29, 0.0  ;;  %v765_v23 = vsub.s32 3, %v2308_v7 }
 0x5c3   :  { %661 = vadd.xlane.f32.xlu0 %v660_v32  ;;  %v1994_v33 = vpop.f32.mrf.mxu1 }
 0x5c4   :  { %v659_v34 = vadd.f32 %v655_v31, %v2298_v4  ;;  %v2144_v4 = vld [vmem:[%s2689_s2 + $0x20] ss:$12 sps:$4 sm:$0xff]   ;;  %v766_v24 = vrot.slane %v2316_v9, %v765_v23 }
 0x5c5   :  { %1996 = vmatpush3.bf16.msra.mxu0 %v2144_v4 }
 0x5c6   :  { %v663_v35 = vsel %vm95_vm1, %v659_v34, 0.0  ;;  %1997 = vmatprep.subr.bf16.mxu0 %v2236_v1 }
 0x5c7   :  { %664 = vadd.xlane.f32.xlu1 %v663_v35 }
 0x5c9   :  { %1998 = vmatpush3.bf16.msra.mxu0 %v2145_v45  ;;  %v2150_v45 = vld [vmem:[%s2689_s2 + $0x48] ss:$12 sps:$4 sm:$0xff]  }
 0x5ca   :  { %2015 = vmatprep.subr.bf16.mxu0 %v2236_v1 }
 0x64c   :  { %v662_v36 = vpop.xlane.xlu0 %661 }
 0x64d   :  { %v667_v37 = vmul.f32 0.03125, %v662_v36 }
 0x64f   :  { %v669_v38 = vsub.f32 %v658_v29, %v667_v37 }
 0x650   :  { %v665_v39 = vpop.xlane.xlu1 %664 }
 0x651   :  { %v668_v41 = vmul.f32 0.03125, %v665_v39  ;;  %v671_v42 = vmul.f32 %v669_v38, %v669_v38 }
 0x653   :  { %v670_v43 = vsub.f32 %v659_v34, %v668_v41  ;;  %v673_v3 = vsel %vm95_vm1, %v671_v42, 0.0 }
 0x654   :  { %674 = vadd.xlane.f32.xlu0 %v673_v3 }
 0x655   :  { %v672_v25 = vmul.f32 %v670_v43, %v670_v43 }
 0x657   :  { %v676_v26 = vsel %vm95_vm1, %v672_v25, 0.0 }
 0x658   :  { %677 = vadd.xlane.f32.xlu0 %v676_v26 }
 0x6dd   :  { %v675_v47 = vpop.xlane.xlu0 %674 }
 0x6de   :  { %v679_v48 = vmul.f32 0.03125, %v675_v47 }
 0x6e0   :  { %v681_v49 = vadd.f32 1e-05, %v679_v48 }
 0x6e1   :  { %v678_v50 = vpop.xlane.xlu0 %677 }
 0x6e2   :  { %2178 = vrsqrt.f32 %v681_v49  ;;  %v680_v51 = vmul.f32 0.03125, %v678_v50 }
 0x6e4   :  { %v682_v52 = vadd.f32 1e-05, %v680_v51 }
 0x6e6   :  { %2180 = vrsqrt.f32 %v682_v52 }
 0x6ef   :  { %v2179_v54 = vpop.eup %2178 }
 0x6f0   :  { %v685_v55 = vmul.f32 %v2179_v54, %v669_v38  ;;  %v866_v54 = vsub.s32 6, %v2308_v7 }
 0x6f2   :  { %v691_v60 = vmul.f32 %v690_v56, %v685_v55 }
 0x6f3   :  { %v2181_v58 = vpop.eup %2180 }
 0x6f4   :  { %v686_v59 = vmul.f32 %v2181_v58, %v670_v43  ;;  %v697_v63 = vadd.f32 %v696_v61, %v691_v60  ;;  %v867_v58 = vrot.slane %v2316_v9, %v866_v54 }
 0x6f6   :  { %v692_v62 = vmul.f32 %v690_v56, %v686_v59  ;;  %v872_v59 = vsub.s32 7, %v2308_v7 }
 0x6f8   :  { %v698_v0 = vadd.f32 %v696_v61, %v692_v62 }
 0x6fa   :  { %v699_v2 = vpack.c.bf16 %v698_v0, %v697_v63 }
 0x6fc   :  { %2000 = vmatmul.mubr.msk.bf16.vlgmr.msra.gmra.mxu0 %vm95_vm1, %v699_v2 }
 0x6fd   :  { %2019 = vmatprep.mubr.msk.bf16.mxu0 %vm2237_vm0, %v2236_v1  ;;  %2016 = vmatpush3.bf16.msra.mxu0 %v2150_v45 }
 0x6fe   :  { %2017 = vmatprep.subr.bf16.mxu0 %v2236_v1 }
 0x701   :  { %2018 = vmatpush3.bf16.msra.mxu0 %v2152_v46 }
 0x702   :  { %2023 = vmatprep.subr.bf16.mxu0 %v2236_v1 }
 0x7bc   :  { %v753_v13 = vpop.f32.mrf.mxu0 }
 0x7bd   :  { %v754_v15 = vadd.f32 %v753_v13, %v703_v12 }
 0x7be   :  { %v2001_v14 = vpop.f32.mrf.mxu0 }
 0x7bf   :  { %v760_v17 = vmax.f32 %v754_v15, 0.0 }
 0x7c0   :  { %v756_v16 = vpop.f32.mrf.mxu0 }
 0x7c1   :  { %v757_v18 = vadd.f32 %v756_v16, %v703_v12 }
 0x7c2   :  { %v2002_v20 = vpop.f32.mrf.mxu0 }
 0x7c3   :  { %v761_v21 = vmax.f32 %v757_v18, 0.0 }
 0x7c5   :  { %v762_v22 = vpack.c.bf16 %v761_v21, %v760_v17 }
 0x7c7   :  { %2012 = vmatmul.mubr.msk.bf16.vlgmr.msra.gmra.mxu1 %vm791_vm5, %v762_v22 }
 0x7c8   :  { %2031 = vmatprep.mubr.msk.bf16.mxu1 %vm2237_vm0, %v2236_v1 }
 0x887   :  { %v829_v27 = vpop.f32.mrf.mxu1 }
 0x888   :  { %v830_v28 = vadd.f32 %v829_v27, %v766_v24 }
 0x889   :  { %v2013_v29 = vpop.f32.mrf.mxu1 }
 0x88a   :  { %v836_v30 = vadd.f32 %v830_v28, %v697_v63  ;;  %v873_v63 = vrot.slane %v2316_v9, %v872_v59  ;;  %v900_v9 = vrot.slane %v2513_v10, %v2311_v8 }
 0x88b   :  { %v832_v31 = vpop.f32.mrf.mxu1 }
 0x88c   :  { %v833_v32 = vadd.f32 %v832_v31, %v766_v24  ;;  %v838_v33 = vsel %vm95_vm1, %v836_v30, 0.0 }
 0x88d   :  { %839 = vadd.xlane.f32.xlu1 %v838_v33  ;;  %v2014_v34 = vpop.f32.mrf.mxu1 }
 0x88e   :  { %v837_v35 = vadd.f32 %v833_v32, %v698_v0 }
 0x890   :  { %v841_v36 = vsel %vm95_vm1, %v837_v35, 0.0 }
 0x891   :  { %842 = vadd.xlane.f32.xlu0 %v841_v36 }
 0x916   :  { %v840_v37 = vpop.xlane.xlu1 %839 }
 0x917   :  { %v844_v38 = vmul.f32 0.03125, %v840_v37 }
 0x919   :  { %v846_v39 = vsub.f32 %v836_v30, %v844_v38 }
 0x91a   :  { %v843_v41 = vpop.xlane.xlu0 %842 }
 0x91b   :  { %v845_v42 = vmul.f32 0.03125, %v843_v41  ;;  %v848_v43 = vmul.f32 %v846_v39, %v846_v39 }
 0x91d   :  { %v847_v3 = vsub.f32 %v837_v35, %v845_v42  ;;  %v850_v25 = vsel %vm95_vm1, %v848_v43, 0.0 }
 0x91e   :  { %851 = vadd.xlane.f32.xlu1 %v850_v25 }
 0x91f   :  { %v849_v26 = vmul.f32 %v847_v3, %v847_v3 }
 0x921   :  { %v853_v4 = vsel %vm95_vm1, %v849_v26, 0.0 }
 0x922   :  { %854 = vadd.xlane.f32.xlu0 %v853_v4 }
 0x9a7   :  { %v852_v47 = vpop.xlane.xlu1 %851 }
 0x9a8   :  { %v856_v48 = vmul.f32 0.03125, %v852_v47 }
 0x9aa   :  { %v858_v49 = vadd.f32 1e-05, %v856_v48 }
 0x9ab   :  { %v855_v50 = vpop.xlane.xlu0 %854 }
 0x9ac   :  { %2182 = vrsqrt.f32 %v858_v49  ;;  %v857_v51 = vmul.f32 0.03125, %v855_v50 }
 0x9ae   :  { %v859_v52 = vadd.f32 1e-05, %v857_v51 }
 0x9b0   :  { %2184 = vrsqrt.f32 %v859_v52 }
 0x9b9   :  { %v2183_v55 = vpop.eup %2182 }
 0x9ba   :  { %v862_v56 = vmul.f32 %v2183_v55, %v846_v39 }
 0x9bc   :  { %v868_v62 = vmul.f32 %v867_v58, %v862_v56 }
 0x9bd   :  { %v2185_v60 = vpop.eup %2184 }
 0x9be   :  { %v863_v61 = vmul.f32 %v2185_v60, %v847_v3  ;;  %v2501_v2 = vadd.f32 %v873_v63, %v868_v62 }
 0x9c0   :  { %v869_v0 = vmul.f32 %v867_v58, %v863_v61 }
 0x9c2   :  { %v2503_v5 = vadd.f32 %v873_v63, %v869_v0 }
 0x9c4   :  { %v896_v6 = vpack.c.bf16 %v2503_v5, %v2501_v2 }
 0x9c6   :  { %2020 = vmatmul.mubr.msk.bf16.vlgmr.msra.gmra.mxu0 %vm95_vm1, %v896_v6 }
 0x9c7   :  { %2025 = vmatprep.mubr.msk.bf16.mxu0 %vm2237_vm0, %v2236_v1 }
 0xa86   :  { %v950_v12 = vpop.f32.mrf.mxu0 }
 0xa87   :  { %v951_v13 = vadd.f32 %v950_v12, %v900_v9 }
 0xa88   :  { %v2021_v14 = vpop.f32.mrf.mxu0 }
 0xa89   :  { %v2517_v15 = vpack.c.bf16 %v951_v13, %v951_v13 }
 0xa8a   :  { %v953_v16 = vpop.f32.mrf.mxu0 }
 0xa8b   :  { %v954_v18 = vadd.f32 %v953_v16, %v900_v9  ;;  %970 = vrot.lane.b32.xlu0 %v2517_v15, %s2238_s30 }
 0xa8c   :  { %v2022_v20 = vpop.f32.mrf.mxu0 }
 0xa8d   :  { %v2128_v17 = vpack.i.bf16 %v954_v18, %v951_v13  ;;  %v966_v21 = vpack.c.bf16 %v954_v18, %v954_v18 }
 0xa8f   :  { %2129 = vrot.lane.b32.xlu1 %v2128_v17, %s2239_s7 }
 0xa93   :  { %1019 = vrot.lane.b32.xlu1 %v966_v21, %s2238_s30 }
 0xafd   :  { %v971_v22 = vpop.permute.xlu0 %970 }
 0xafe   :  { %v976_v8 = vsel %vm155_vm2, %v971_v22, 0 }
 0xaff   :  { %2024 = vmatpush3.bf16.xpose.msra.mxu0 %v976_v8 }
 0xb00   :  { %2035 = vmatprep.subr.bf16.mxu0 %v2236_v1 }
 0xb01   :  { %v2130_v24 = vpop.permute.xlu1 %2129 }
 0xb02   :  { %v2132_v27 = vunpack.i.h.bf16 %v2130_v24  ;;  %v2131_v28 = vunpack.i.l.bf16 %v2130_v24 }
 0xb04   :  { %v2525_v29 = vpack.c.bf16 %v2132_v27, %v2132_v27  ;;  %v2527_v30 = vpack.c.bf16 %v2131_v28, %v2131_v28 }
 0xb05   :  { %v1020_v31 = vpop.permute.xlu1 %1019 }
 0xb06   :  { %v1025_v32 = vsel %vm155_vm2, %v1020_v31, 0  ;;  %2026 = vmatmul.mubr.msk.bf16.vlgmr.msra.gmra.mxu0 %vm155_vm2, %v2517_v15  ;;  %1117 = vrot.lane.b32.xlu0 %v2525_v29, %s2238_s30 }
 0xb07   :  { %1068 = vrot.lane.b32.xlu1 %v2527_v30, %s2238_s30  ;;  %2030 = vmatpush3.bf16.xpose.msra.mxu1 %v1025_v32 }
 0xb08   :  { %2041 = vmatprep.subr.bf16.mxu1 %v2236_v1  ;;  %2037 = vmatprep.mubr.msk.bf16.mxu0 %vm2237_vm0, %v2236_v1 }
 0xb0e   :  { %2032 = vmatmul.mubr.msk.bf16.vlgmr.msra.gmra.mxu1 %vm155_vm2, %v966_v21 }
 0xb0f   :  { %2043 = vmatprep.mubr.msk.bf16.mxu1 %vm2237_vm0, %v2236_v1 }
 0xb78   :  { %v1118_v33 = vpop.permute.xlu0 %1117 }
 0xb79   :  { %v1123_v34 = vsel %vm155_vm2, %v1118_v33, 0  ;;  %v1069_v35 = vpop.permute.xlu1 %1068 }
 0xb7a   :  { %v1074_v36 = vsel %vm155_vm2, %v1069_v35, 0  ;;  %2042 = vmatpush3.bf16.xpose.msra.mxu1 %v1123_v34 }
 0xb7b   :  { %2036 = vmatpush3.bf16.xpose.msra.mxu0 %v1074_v36  ;;  %2053 = vmatprep.subr.bf16.mxu1 %v2236_v1 }
 0xb7c   :  { %2047 = vmatprep.subr.bf16.mxu0 %v2236_v1 }
 0xb81   :  { %2044 = vmatmul.mubr.msk.bf16.vlgmr.msra.gmra.mxu1 %vm155_vm2, %v2525_v29 }
 0xb82   :  { %2038 = vmatmul.mubr.msk.bf16.vlgmr.msra.gmra.mxu0 %vm155_vm2, %v2527_v30  ;;  %2055 = vmatprep.mubr.msk.bf16.mxu1 %vm2237_vm0, %v2236_v1 }
 0xb83   :  { %2049 = vmatprep.mubr.msk.bf16.mxu0 %vm2237_vm0, %v2236_v1 }
 0xbc6   :  { %v1012_v37 = vpop.f32.mrf.mxu0 }
 0xbc7   :  { %v1013_v38 = vadd.f32 %v1012_v37, %v2370_v44 }
 0xbc8   :  { %v2027_v39 = vpop.f32.mrf.mxu0 }
 0xbc9   :  { %v1165_v41 = vsel %vm349_vm3, %v1013_v38, -inf }
 0xbca   :  { %1166 = vmax.xlane.f32.xlu1 %v1165_v41  ;;  %v1015_v42 = vpop.f32.mrf.mxu0 }
 0xbcc   :  { %v2028_v43 = vpop.f32.mrf.mxu0 }
 0xbce   :  { %v1061_v3 = vpop.f32.mrf.mxu1 }
 0xbcf   :  { %v1062_v25 = vadd.f32 %v1061_v3, %v2366_v40 }
 0xbd0   :  { %v2033_v26 = vpop.f32.mrf.mxu1 }
 0xbd1   :  { %v1168_v4 = vsel %vm349_vm3, %v1062_v25, -inf }
 0xbd2   :  { %1169 = vmax.xlane.f32.xlu0 %v1168_v4  ;;  %v1064_v45 = vpop.f32.mrf.mxu1 }
 0xbd4   :  { %v2034_v46 = vpop.f32.mrf.mxu1 }
 0xc41   :  { %v1159_v47 = vpop.f32.mrf.mxu1 }
 0xc42   :  { %v1110_v48 = vpop.f32.mrf.mxu0  ;;  %v1160_v49 = vadd.f32 %v1159_v47, %v2366_v40 }
 0xc43   :  { %v1111_v50 = vadd.f32 %v1110_v48, %v2370_v44  ;;  %v2045_v51 = vpop.f32.mrf.mxu1 }
 0xc44   :  { %v2039_v52 = vpop.f32.mrf.mxu0  ;;  %v1174_v55 = vsel %vm349_vm3, %v1160_v49, -inf  ;;  %v2154_v51 = vld [vmem:[%s2689_s2 + $0x4c] ss:$12 sps:$4 sm:$0xff]  }
 0xc45   :  { %v1162_v56 = vpop.f32.mrf.mxu1  ;;  %1175 = vmax.xlane.f32.xlu1 %v1174_v55  ;;  %v1171_v58 = vsel %vm349_vm3, %v1111_v50, -inf }
 0xc46   :  { %1172 = vmax.xlane.f32.xlu0 %v1171_v58  ;;  %v1113_v60 = vpop.f32.mrf.mxu0 }
 0xc47   :  { %v2046_v61 = vpop.f32.mrf.mxu1 }
 0xc48   :  { %v2040_v62 = vpop.f32.mrf.mxu0 }
 0xc53   :  { %v1167_v63 = vpop.xlane.xlu1 %1166 }
 0xc54   :  { %v1177_v0 = vsub.f32 %v1013_v38, %v1167_v63  ;;  %v2155_v63 = vld [vmem:[%s2689_s2 + $0x34] ss:$12 sps:$4 sm:$0xff]  }
 0xc56   :  { %1261 = vrot.lane.b32.xlu1 %v966_v21, %s2241_s1  ;;  %v1181_v9 = vmul.f32 1.442695, %v1177_v0 }
 0xc5b   :  { %v1170_v40 = vpop.xlane.xlu0 %1169 }
 0xc5c   :  { %1213 = vrot.lane.b32.xlu0 %v2517_v15, %s2241_s1  ;;  %v1178_v44 = vsub.f32 %v1062_v25, %v1170_v40 }
 0xc5e   :  { %v1183_v6 = vmul.f32 1.442695, %v1178_v44 }
 0xc60   :  { %2186 = vpow2.f32 %v1183_v6 }
 0xc61   :  { %2188 = vpow2.f32 %v1181_v9 }
 0xc6d   :  { %v2187_v12 = vpop.eup %2186 }
 0xc6e   :  { %v2189_v13 = vpop.eup %2188  ;;  %v1192_v14 = vsel %vm349_vm3, %v2187_v12, 0.0 }
 0xc6f   :  { %v1189_v16 = vsel %vm349_vm3, %v2189_v13, 0.0 }
 0xc7a   :  { %1193 = vadd.xlane.f32.xlu1 %v1192_v14 }
 0xc7b   :  { %1190 = vadd.xlane.f32.xlu0 %v1189_v16 }
 0xcce   :  { %v1176_v18 = vpop.xlane.xlu1 %1175 }
 0xccf   :  { %v1180_v20 = vsub.f32 %v1160_v49, %v1176_v18  ;;  %v1173_v17 = vpop.xlane.xlu0 %1172 }
 0xcd0   :  { %v1179_v15 = vsub.f32 %v1111_v50, %v1173_v17 }
 0xcd1   :  { %v1187_v21 = vmul.f32 1.442695, %v1180_v20 }
 0xcd2   :  { %v1185_v22 = vmul.f32 1.442695, %v1179_v15  ;;  %v1262_v8 = vpop.permute.xlu1 %1261 }
 0xcd3   :  { %2190 = vpow2.f32 %v1187_v21  ;;  %v1267_v24 = vsel %vm403_vm4, %v1262_v8, 0  ;;  %v1214_v27 = vpop.permute.xlu0 %1213 }
 0xcd4   :  { %2192 = vpow2.f32 %v1185_v22  ;;  %v1219_v28 = vsel %vm403_vm4, %v1214_v27, 0  ;;  %2054 = vmatpush3.bf16.msra.mxu1 %v1267_v24  ;;  %v1419_v24 = vrot.slane %v2513_v10, %v604_v19 }
 0xcd5   :  { %2048 = vmatpush3.bf16.msra.mxu0 %v1219_v28  ;;  %2065 = vmatprep.subr.bf16.mxu1 %v2236_v1 }
 0xcd6   :  { %2059 = vmatprep.subr.bf16.mxu0 %v2236_v1 }
 0xce0   :  { %v2191_v31 = vpop.eup %2190 }
 0xce1   :  { %v2193_v32 = vpop.eup %2192  ;;  %v1198_v33 = vsel %vm349_vm3, %v2191_v31, 0.0 }
 0xce2   :  { %1199 = vadd.xlane.f32.xlu1 %v1198_v33  ;;  %v1195_v34 = vsel %vm349_vm3, %v2193_v32, 0.0 }
 0xce3   :  { %1196 = vadd.xlane.f32.xlu0 %v1195_v34 }
 0xcf3   :  { %1309 = vrot.lane.b32.xlu1 %v2527_v30, %s2241_s1 }
 0xcf9   :  { %1357 = vrot.lane.b32.xlu0 %v2525_v29, %s2241_s1 }
 0xd03   :  { %v1194_v35 = vpop.xlane.xlu1 %1193 }
 0xd04   :  { %2194 = vrcp.f32 %v1194_v35  ;;  %v1191_v36 = vpop.xlane.xlu0 %1190 }
 0xd05   :  { %2196 = vrcp.f32 %v1191_v36 }
 0xd11   :  { %v2195_v37 = vpop.eup %2194 }
 0xd12   :  { %v2197_v38 = vpop.eup %2196  ;;  %v1206_v39 = vmul.f32 %v2195_v37, %v2187_v12 }
 0xd13   :  { %v1205_v41 = vmul.f32 %v2197_v38, %v2189_v13 }
 0xd14   :  { %v1210_v42 = vpack.c.bf16 %v1206_v39, %v1206_v39 }
 0xd15   :  { %v1209_v43 = vpack.c.bf16 %v1205_v41, %v1205_v41 }
 0xd16   :  { %2056 = vmatmul.mubr.msk.bf16.vlgmr.msra.gmra.mxu1 %vm349_vm3, %v1210_v42 }
 0xd17   :  { %2050 = vmatmul.mubr.msk.bf16.vlgmr.msra.gmra.mxu0 %vm349_vm3, %v1209_v43  ;;  %2067 = vmatprep.mubr.msk.bf16.mxu1 %vm2237_vm0, %v2236_v1 }
 0xd18   :  { %2061 = vmatprep.mubr.msk.bf16.mxu0 %vm2237_vm0, %v2236_v1 }
 0xd6b   :  { %v1200_v29 = vpop.xlane.xlu1 %1199 }
 0xd6c   :  { %2198 = vrcp.f32 %v1200_v29  ;;  %v1197_v30 = vpop.xlane.xlu0 %1196 }
 0xd6d   :  { %2200 = vrcp.f32 %v1197_v30 }
 0xd6f   :  { %v1310_v3 = vpop.permute.xlu1 %1309 }
 0xd70   :  { %v1315_v25 = vsel %vm403_vm4, %v1310_v3, 0  ;;  %v1358_v26 = vpop.permute.xlu0 %1357 }
 0xd71   :  { %v1363_v4 = vsel %vm403_vm4, %v1358_v26, 0  ;;  %2060 = vmatpush3.bf16.msra.mxu0 %v1315_v25  ;;  %v2157_v26 = vld [vmem:[%s2689_s2 + $0x38] ss:$12 sps:$4 sm:$0xff]  }
 0xd72   :  { %2066 = vmatpush3.bf16.msra.mxu1 %v1363_v4  ;;  %2071 = vmatprep.subr.bf16.mxu0 %v2236_v1  ;;  %v2158_v4 = vld [vmem:[%s2690_s3 + $0x38] sm:$0xff]  }
 0xd73   :  { %2079 = vmatprep.subr.bf16.mxu1 %v2236_v1 }
 0xd79   :  { %v2199_v45 = vpop.eup %2198 }
 0xd7a   :  { %v2201_v46 = vpop.eup %2200  ;;  %v1208_v47 = vmul.f32 %v2199_v45, %v2191_v31 }
 0xd7b   :  { %v1207_v48 = vmul.f32 %v2201_v46, %v2193_v32 }
 0xd7c   :  { %v1212_v49 = vpack.c.bf16 %v1208_v47, %v1208_v47 }
 0xd7d   :  { %v1211_v50 = vpack.c.bf16 %v1207_v48, %v1207_v48 }
 0xd7e   :  { %2068 = vmatmul.mubr.msk.bf16.vlgmr.msra.gmra.mxu1 %vm349_vm3, %v1212_v49 }
 0xd7f   :  { %2062 = vmatmul.mubr.msk.bf16.vlgmr.msra.gmra.mxu0 %vm349_vm3, %v1211_v50  ;;  %2083 = vmatprep.mubr.msk.bf16.mxu1 %vm2237_vm0, %v2236_v1 }
 0xd80   :  { %2075 = vmatprep.mubr.msk.bf16.mxu0 %vm2237_vm0, %v2236_v1  ;;  %2072 = vmatpush3.bf16.msra.mxu0 %v2154_v51 }
 0xd81   :  { %2073 = vmatprep.subr.bf16.mxu0 %v2236_v1 }
 0xd84   :  { %2074 = vmatpush3.bf16.msra.mxu0 %v2155_v63 }
 0xd85   :  { %2087 = vmatprep.subr.bf16.mxu0 %v2236_v1 }
 0xdd6   :  { %v1303_v52 = vpop.f32.mrf.mxu1 }
 0xdd7   :  { %v1255_v55 = vpop.f32.mrf.mxu0 }
 0xdd8   :  { %v2057_v56 = vpop.f32.mrf.mxu1 }
 0xdd9   :  { %v2051_v58 = vpop.f32.mrf.mxu0 }
 0xdda   :  { %v1306_v60 = vpop.f32.mrf.mxu1 }
 0xddb   :  { %v1258_v61 = vpop.f32.mrf.mxu0 }
 0xddc   :  { %v2058_v62 = vpop.f32.mrf.mxu1  ;;  %v1509_v61 = vrot.slane %v2513_v10, %v695_v57  ;;  %v2160_v57 = vld [vmem:[%s2690_s3 + $0x28] sm:$0xff]  }
 0xddd   :  { %v2052_v40 = vpop.f32.mrf.mxu0 }
 0xe3e   :  { %v1399_v44 = vpop.f32.mrf.mxu1 }
 0xe3f   :  { %v1351_v0 = vpop.f32.mrf.mxu0 }
 0xe40   :  { %v2133_v6 = vpack.i.bf16 %v1399_v44, %v1351_v0  ;;  %v2069_v9 = vpop.f32.mrf.mxu1  ;;  %v2161_v0 = vld [vmem:[%s2690_s3 + $0x20] sm:$0xff]  }
 0xe41   :  { %v2063_v12 = vpop.f32.mrf.mxu0 }
 0xe42   :  { %2134 = vrot.lane.b32.xlu1 %v2133_v6, %s2242_s14  ;;  %v1402_v13 = vpop.f32.mrf.mxu1  ;;  %v1516_v6 = vrot.slane %v2513_v10, %v702_v11 }
 0xe43   :  { %v1354_v14 = vpop.f32.mrf.mxu0 }
 0xe44   :  { %v2070_v16 = vpop.f32.mrf.mxu1 }
 0xe45   :  { %v2064_v18 = vpop.f32.mrf.mxu0 }
 0xeb4   :  { %v2135_v20 = vpop.permute.xlu1 %2134 }
 0xeb5   :  { %v2137_v17 = vunpack.i.h.bf16 %v2135_v20  ;;  %v2136_v15 = vunpack.i.l.bf16 %v2135_v20 }
 0xeb7   :  { %v1414_v21 = vsel %vm155_vm2, %v1303_v52, %v2137_v17  ;;  %v1413_v22 = vsel %vm155_vm2, %v1255_v55, %v2136_v15  ;;  %v1503_v55 = vrot.slane %v2513_v10, %v689_v53  ;;  %v2159_v53 = vld [vmem:[%s2690_s3 + $0x30] sm:$0xff]  }
 0xeb8   :  { %v1415_v8 = vpack.c.bf16 %v1414_v21, %v1413_v22  ;;  %v1579_v21 = vrot.slane %v2513_v10, %v765_v23 }
 0xeba   :  { %2076 = vmatmul.mubr.msk.bf16.vlgmr.msra.gmra.mxu0 %vm95_vm1, %v1415_v8 }
 0xebb   :  { %2095 = vmatprep.mubr.msk.bf16.mxu0 %vm2237_vm0, %v2236_v1  ;;  %2088 = vmatpush3.bf16.msra.mxu0 %v2158_v4 }
 0xebc   :  { %2089 = vmatprep.subr.bf16.mxu0 %v2236_v1 }
 0xebf   :  { %2090 = vmatpush3.bf16.msra.mxu0 %v2159_v53 }
 0xec0   :  { %2091 = vmatprep.subr.bf16.mxu0 %v2236_v1 }
 0xec3   :  { %2092 = vmatpush3.bf16.msra.mxu0 %v2160_v57 }
 0xec4   :  { %2093 = vmatprep.subr.bf16.mxu0 %v2236_v1 }
 0xec7   :  { %2094 = vmatpush3.bf16.msra.mxu0 %v2161_v0 }
 0xf7a   :  { %v1465_v27 = vpop.f32.mrf.mxu0 }
 0xf7b   :  { %v1466_v28 = vadd.f32 %v1465_v27, %v1419_v24 }
 0xf7c   :  { %v2077_v31 = vpop.f32.mrf.mxu0 }
 0xf7d   :  { %v1472_v32 = vadd.f32 %v1466_v28, %v2501_v2 }
 0xf7e   :  { %v1468_v33 = vpop.f32.mrf.mxu0 }
 0xf7f   :  { %v1469_v34 = vadd.f32 %v1468_v33, %v1419_v24  ;;  %v1474_v35 = vsel %vm95_vm1, %v1472_v32, 0.0 }
 0xf80   :  { %1475 = vadd.xlane.f32.xlu0 %v1474_v35  ;;  %v2078_v36 = vpop.f32.mrf.mxu0 }
 0xf81   :  { %v1473_v37 = vadd.f32 %v1469_v34, %v2503_v5  ;;  %v2156_v5 = vld [vmem:[%s2689_s2 + $0x50] ss:$12 sps:$4 sm:$0xff]  }
 0xf82   :  { %2080 = vmatpush3.bf16.msra.mxu1 %v2156_v5 }
 0xf83   :  { %v1477_v38 = vsel %vm95_vm1, %v1473_v37, 0.0  ;;  %2081 = vmatprep.subr.bf16.mxu1 %v2236_v1 }
 0xf84   :  { %1478 = vadd.xlane.f32.xlu1 %v1477_v38 }
 0xf86   :  { %2082 = vmatpush3.bf16.msra.mxu1 %v2157_v26 }
 0xf87   :  { %2099 = vmatprep.subr.mxu1 %v2236_v1 }
0x1009   :  { %v1476_v39 = vpop.xlane.xlu0 %1475 }
0x100a   :  { %v1480_v41 = vmul.f32 0.03125, %v1476_v39 }
0x100c   :  { %v1482_v42 = vsub.f32 %v1472_v32, %v1480_v41 }
0x100d   :  { %v1479_v19 = vpop.xlane.xlu1 %1478 }
0x100e   :  { %v1481_v43 = vmul.f32 0.03125, %v1479_v19  ;;  %v1484_v29 = vmul.f32 %v1482_v42, %v1482_v42 }
0x1010   :  { %v1483_v30 = vsub.f32 %v1473_v37, %v1481_v43  ;;  %v1486_v2 = vsel %vm95_vm1, %v1484_v29, 0.0  ;;  %v1691_v29 = vld [vmem:[%s2692_s5 + $0x18] sm:$0xff] }
0x1011   :  { %1487 = vadd.xlane.f32.xlu0 %v1486_v2  ;;  %v1689_v2 = vld [vmem:[%s2692_s5 + $0x8] sm:$0xff] }
0x1012   :  { %v1485_v3 = vmul.f32 %v1483_v30, %v1483_v30 }
0x1014   :  { %v1489_v25 = vsel %vm95_vm1, %v1485_v3, 0.0  ;;  %v1688_v3 = vld [vmem:[%s2692_s5] sm:$0xff] }
0x1015   :  { %1490 = vadd.xlane.f32.xlu0 %v1489_v25 }
0x109a   :  { %v1488_v45 = vpop.xlane.xlu0 %1487 }
0x109b   :  { %v1492_v46 = vmul.f32 0.03125, %v1488_v45 }
0x109d   :  { %v1494_v47 = vadd.f32 1e-05, %v1492_v46 }
0x109e   :  { %v1491_v48 = vpop.xlane.xlu0 %1490 }
0x109f   :  { %2202 = vrsqrt.f32 %v1494_v47  ;;  %v1493_v49 = vmul.f32 0.03125, %v1491_v48 }
0x10a1   :  { %v1495_v50 = vadd.f32 1e-05, %v1493_v49  ;;  %v1679_v49 = vrot.slane %v2513_v10, %v866_v54 }
0x10a3   :  { %2204 = vrsqrt.f32 %v1495_v50 }
0x10ac   :  { %v2203_v51 = vpop.eup %2202 }
0x10ad   :  { %v1498_v52 = vmul.f32 %v2203_v51, %v1482_v42 }
0x10af   :  { %v1504_v60 = vmul.f32 %v1503_v55, %v1498_v52 }
0x10b0   :  { %v2205_v56 = vpop.eup %2204 }
0x10b1   :  { %v1499_v58 = vmul.f32 %v2205_v56, %v1483_v30  ;;  %v1510_v40 = vadd.f32 %v1509_v61, %v1504_v60  ;;  %v1690_v30 = vld [vmem:[%s2692_s5 + $0x10] sm:$0xff] }
0x10b3   :  { %v1505_v62 = vmul.f32 %v1503_v55, %v1499_v58 }
0x10b5   :  { %v1511_v63 = vadd.f32 %v1509_v61, %v1505_v62  ;;  %v1864_v62 = vld [vmem:[%s2692_s5 + $0x20] ss:$0 sm:$0xff]  ;;  %s2214_s5 = scalar_lea.vmem %s1795_s8, 32 }
0x10b6   :  { %p2215_p0 = scmp.ne.s32.totalorder %s1795_s8, %s2214_s5  ;;  %p2220_p2 = scmp.lt.s32.totalorder %s2214_s5, %s2214_s5 }
0x10b7   :  { %v1512_v44 = vpack.c.bf16 %v1511_v63, %v1510_v40 }
0x10b8   :  { %p2221_p3 = por %p2220_p2, %p2219_p1 }
0x10b9   :  { %2084 = vmatmul.mubr.msk.bf16.vlgmr.msra.gmra.mxu1 %vm95_vm1, %v1512_v44 }
0x10ba   :  { %2107 = vmatprep.mubr.msk.f32.mxu1 %vm2237_vm0, %v2236_v1  ;;  %2100 = vmatpush3.msra.mxu1 %v1691_v29  ;;  %p2222_p4 = pnand %p2221_p3, %p2215_p0 }
0x10bb   :  { %2101 = vmatprep.subr.mxu1 %v2236_v1 }
0x10bc   :  { %2102 = vmatpush3.msra.mxu1 %v1690_v30 }
0x10bd   :  { %2103 = vmatprep.subr.mxu1 %v2236_v1 }
0x10be   :  { %2104 = vmatpush3.msra.mxu1 %v1689_v2 }
0x10bf   :  { %2105 = vmatprep.subr.mxu1 %v2236_v1  ;;  %v1685_v1 = vrot.slane %v2513_v10, %v872_v59 }
0x10c0   :  { %2106 = vmatpush3.msra.mxu1 %v1688_v3 }
0x1179   :  { %v1566_v9 = vpop.f32.mrf.mxu1 }
0x117a   :  { %v1567_v13 = vadd.f32 %v1566_v9, %v1516_v6 }
0x117b   :  { %v2085_v12 = vpop.f32.mrf.mxu1 }
0x117c   :  { %v1573_v20 = vmax.f32 %v1567_v13, 0.0 }
0x117d   :  { %v1569_v14 = vpop.f32.mrf.mxu1 }
0x117e   :  { %v1570_v16 = vadd.f32 %v1569_v14, %v1516_v6 }
0x117f   :  { %v2086_v18 = vpop.f32.mrf.mxu1 }
0x1180   :  { %v1574_v17 = vmax.f32 %v1570_v16, 0.0 }
0x1182   :  { %v1575_v15 = vpack.c.bf16 %v1574_v17, %v1573_v20 }
0x1184   :  { %2096 = vmatmul.mubr.msk.bf16.vlgmr.msra.gmra.mxu0 %vm791_vm5, %v1575_v15 }
0x1244   :  { %v1641_v22 = vpop.f32.mrf.mxu0 }
0x1245   :  { %v1642_v8 = vadd.f32 %v1641_v22, %v1579_v21 }
0x1246   :  { %v2097_v24 = vpop.f32.mrf.mxu0 }
0x1247   :  { %v1648_v27 = vadd.f32 %v1642_v8, %v1510_v40 }
0x1248   :  { %v1644_v11 = vpop.f32.mrf.mxu0 }
0x1249   :  { %v1645_v28 = vadd.f32 %v1644_v11, %v1579_v21  ;;  %v1650_v31 = vsel %vm95_vm1, %v1648_v27, 0.0 }
0x124a   :  { %1651 = vadd.xlane.f32.xlu0 %v1650_v31  ;;  %v2098_v32 = vpop.f32.mrf.mxu0 }
0x124b   :  { %v1649_v33 = vadd.f32 %v1645_v28, %v1511_v63 }
0x124d   :  { %v1653_v34 = vsel %vm95_vm1, %v1649_v33, 0.0 }
0x124e   :  { %1654 = vadd.xlane.f32.xlu1 %v1653_v34 }
0x12d3   :  { %v1652_v35 = vpop.xlane.xlu0 %1651 }
0x12d4   :  { %v1656_v36 = vmul.f32 0.03125, %v1652_v35 }
0x12d6   :  { %v1658_v37 = vsub.f32 %v1648_v27, %v1656_v36 }
0x12d7   :  { %v1655_v38 = vpop.xlane.xlu1 %1654 }
0x12d8   :  { %v1657_v39 = vmul.f32 0.03125, %v1655_v38  ;;  %v1660_v23 = vmul.f32 %v1658_v37, %v1658_v37 }
0x12da   :  { %v1659_v41 = vsub.f32 %v1649_v33, %v1657_v39  ;;  %v1662_v42 = vsel %vm95_vm1, %v1660_v23, 0.0 }
0x12db   :  { %1663 = vadd.xlane.f32.xlu0 %v1662_v42 }
0x12dc   :  { %v1661_v19 = vmul.f32 %v1659_v41, %v1659_v41 }
0x12de   :  { %v1665_v43 = vsel %vm95_vm1, %v1661_v19, 0.0 }
0x12df   :  { %1666 = vadd.xlane.f32.xlu1 %v1665_v43 }
0x1364   :  { %v1664_v25 = vpop.xlane.xlu0 %1663 }
0x1365   :  { %v1668_v5 = vmul.f32 0.03125, %v1664_v25 }
0x1367   :  { %v1670_v26 = vadd.f32 1e-05, %v1668_v5 }
0x1368   :  { %v1667_v4 = vpop.xlane.xlu1 %1666 }
0x1369   :  { %2206 = vrsqrt.f32 %v1670_v26  ;;  %v1669_v45 = vmul.f32 0.03125, %v1667_v4 }
0x136b   :  { %v1671_v46 = vadd.f32 1e-05, %v1669_v45 }
0x136d   :  { %2208 = vrsqrt.f32 %v1671_v46 }
0x1376   :  { %v2207_v47 = vpop.eup %2206 }
0x1377   :  { %v1674_v48 = vmul.f32 %v2207_v47, %v1658_v37 }
0x1379   :  { %v1680_v52 = vmul.f32 %v1679_v49, %v1674_v48 }
0x137a   :  { %v2209_v50 = vpop.eup %2208 }
0x137b   :  { %v1675_v51 = vmul.f32 %v2209_v50, %v1659_v41  ;;  %v1686_v58 = vadd.f32 %v1685_v1, %v1680_v52 }
0x137d   :  { %v1681_v55 = vmul.f32 %v1679_v49, %v1675_v51 }
0x137f   :  { %v1687_v56 = vadd.f32 %v1685_v1, %v1681_v55 }
0x1381   :  { %v1699_v60 = vrot.slane %v1687_v56, 7 }
0x1383   :  { %v1701_v61 = vsel %vm1700_vm6, %v1699_v60, %v1686_v58 }
0x1384   :  { %2108 = vmatmul.mubr.msk.f32.vlgmr.msra.gmra.mxu1 %vm95_vm1, %v1701_v61 }
0x1444   :  { %v1770_v54 = vpop.f32.mrf.mxu1 }
0x1445   :  { %v1771_v40 = vadd.f32 %v1864_v62, %v1770_v54 }
0x1446   :  { %v2109_v63 = vpop.f32.mrf.mxu1 }
0x1447   :  { %v1775_v44 = vsel %vm1774_vm7, %v1771_v40, -inf }
0x1448   :  { %1776 = vmax.xlane.f32.xlu1 %v1775_v44 }
0x14d1   :  { %v1777_v7 = vpop.xlane.xlu1 %1776 }
0x14d2   :  { %v1778_v53 = vsub.f32 %v1771_v40, %v1777_v7 }
0x14d4   :  { %v1779_v59 = vmul.f32 1.442695, %v1778_v53 }
0x14d6   :  { %2210 = vpow2.f32 %v1779_v59 }
0x14e3   :  { %v2211_v10 = vpop.eup %2210 }
0x14e4   :  { %v1781_v57 = vsel %vm1774_vm7, %v2211_v10, 0.0 }
0x14e5   :  { %1782 = vadd.xlane.f32.xlu0 %v1781_v57 }
0x156e   :  { %v1783_v0 = vpop.xlane.xlu0 %1782 }
0x156f   :  { %2212 = vlog2.f32 %v1783_v0 }
0x157c   :  { %v2213_v6 = vpop.eup %2212 }
0x157d   :  { %v1785_v9 = vmul.f32 0.6931472, %v2213_v6 }
0x157f   :  { %v1786_v12 = vsub.f32 %v1778_v53, %v1785_v9 }
0x1581   :  { %1787 = vst [vmem:[#allocation2] sm:$0x3] %v1786_v12 }
0x1582   :  { %2225 = shalt.err (!%p2222_p4)
}
0x1583   :  { %1797 = dma.vmem_to_hbm [thread:$0]  %s1795_s8, 32, %s2693_s6, [#allocation3]  }
0x1584   :  { %2234 = dma.done.wait [#allocation3], 32  }
0x1585   :  { %2235 = vsyncadd [#allocation3], 4294967264 }
0x1586   :  { %1801 = vsyncpa [#allocation3], 1 }

</bundles_post_ra>
